<compile_context>
chip_gen: v7x
topology: tpu7x:2x2x1
jax: 0.10.0
libtpu: 0.0.40
codegen_flags: <defaults>
</compile_context>

<pallas_src>
import functools

import jax
import jax.numpy as jnp
from jax import lax
from jax.experimental import pallas as pl
from jax.experimental.pallas import tpu as pltpu


def _round_up(a, b):
    return (a + b - 1) // b * b


def _lstm_cell(z, c, H):
    """PyTorch LSTM cell: z = packed pre-activations [i|f|g|o] of shape (1, 4H)."""
    i = jax.nn.sigmoid(z[:, 0 * H:1 * H])
    f = jax.nn.sigmoid(z[:, 1 * H:2 * H])
    g = jnp.tanh(z[:, 2 * H:3 * H])
    o = jax.nn.sigmoid(z[:, 3 * H:4 * H])
    c_new = f * c + i * g
    h_new = o * jnp.tanh(c_new)
    return h_new, c_new


# ----------------------------------------------------------------------------
# Fused kernel: 2-layer LSTM (skew-interleaved) + FC + ReLU + LogSoftmax.
# ----------------------------------------------------------------------------
def rnn_fused_kernel(x_ref, wih0_ref, whh0_ref, b0_ref,
                     w1s_ref, b1_ref, fcw_ref, fcb_ref,
                     out_ref, h1_seq_ref, *, valid_v, is_test):
    S = x_ref.shape[0]
    H = whh0_ref.shape[0]
    f32, bf16 = jnp.float32, jnp.bfloat16

    whh0 = whh0_ref[...]                                    # (H, 4H)  bf16
    w1s = w1s_ref[...]                                      # (2H, 4H) bf16
    b1 = b1_ref[...]                                        # (1, 4H)  f32

    # Layer-0 input projection hoisted out of the recurrence: one batched MXU matmul.
    z0 = jnp.dot(x_ref[...], wih0_ref[...],
                 preferred_element_type=f32) + b0_ref[...]  # (S, 4H) f32

    h0 = jnp.zeros((1, H), f32)
    c0 = jnp.zeros((1, H), f32)
    h1 = jnp.zeros((1, H), f32)
    c1 = jnp.zeros((1, H), f32)

    # Skew-interleaved recurrences (statically unrolled; S tiny & compile-time known):
    #   iteration t runs layer-0 step t AND layer-1 step t-1, so layer-1's small
    #   matmuls hide under layer-0's serial chain.  Layer-1 fuses its input
    #   projection + recurrence into one (1,2H)x(2H,4H) matmul.
    for t in range(S + 1):
        h0_prev = h0                                        # == h0_{t-1}
        if t < S:
            z_a = z0[t:t + 1, :] + jnp.dot(h0.astype(bf16), whh0,
                                           preferred_element_type=f32)
            h0, c0 = _lstm_cell(z_a, c0, H)
        if t >= 1:
            x1 = jnp.concatenate([h0_prev, h1], axis=1).astype(bf16)   # (1, 2H)
            z_b = b1 + jnp.dot(x1, w1s, preferred_element_type=f32)
            h1, c1 = _lstm_cell(z_b, c1, H)
            if not is_test:
                h1_seq_ref[t - 1:t, :] = h1                 # row write to VMEM scratch

    # FC + ReLU + LogSoftmax(dim=1).  Padded vocab lanes are masked to -1e30 so the
    # reductions over the real V columns are exact.
    feats = h1 if is_test else h1_seq_ref[...]              # (S_out, H) f32
    logits = jnp.dot(feats.astype(bf16), fcw_ref[...],
                     preferred_element_type=f32) + fcb_ref[...]   # (S_out, Vp)
    act = jnp.maximum(logits, 0.0)                          # F.relu
    col = lax.broadcasted_iota(jnp.int32, act.shape, 1)
    act = jnp.where(col < valid_v, act, -1e30)
    m = jnp.max(act, axis=-1, keepdims=True)
    zc = act - m
    lse = jnp.log(jnp.sum(jnp.exp(zc), axis=-1, keepdims=True))
    out_ref[...] = zc - lse                                 # lane-dense (S_out,128) store


# ----------------------------------------------------------------------------
# Parameter construction (matches PyTorch inits), packed-gate / stacked layout.
# ----------------------------------------------------------------------------
def make_params(key, vocab_len, embedding_dim, hidden_dim):
    ks = jax.random.split(key, 12)
    u = lambda k, shape, b: jax.random.uniform(k, shape, jnp.float32, -b, b)

    H, E, V = hidden_dim, embedding_dim, vocab_len
    Vp = _round_up(V, 128)

    # word embedding: uniform(-1, 1).
    embed = u(ks[0], (V, E), 1.0)

    # LSTM (PyTorch default init: U(-1/sqrt(H), 1/sqrt(H))), gate order i,f,g,o.
    s = 1.0 / float(H) ** 0.5
    wih0 = u(ks[1], (4 * H, E), s)
    whh0 = u(ks[2], (4 * H, H), s)
    bih0 = u(ks[3], (4 * H,), s)
    bhh0 = u(ks[4], (4 * H,), s)
    wih1 = u(ks[5], (4 * H, H), s)
    whh1 = u(ks[6], (4 * H, H), s)
    bih1 = u(ks[7], (4 * H,), s)
    bhh1 = u(ks[8], (4 * H,), s)

    # fc: weights_init -> uniform(+-sqrt(6/(fan_in+fan_out))), bias = 0.
    wb = (6.0 / (H + V)) ** 0.5
    fc_w = u(ks[9], (V, H), wb)
    fc_w_p = jnp.zeros((H, Vp), jnp.float32).at[:, :V].set(fc_w.T)
    fc_b_p = jnp.zeros((1, Vp), jnp.float32)

    bf16 = jnp.bfloat16
    return dict(
        embed=embed,                                         # (V, E)  f32
        wih0=wih0.T.astype(bf16),                            # (E, 4H) bf16, gates packed
        whh0=whh0.T.astype(bf16),                            # (H, 4H) bf16
        b0=(bih0 + bhh0).reshape(1, 4 * H),                  # (1, 4H) f32
        # Layer-1 K-stacked weight: rows 0:H multiply h0_t, rows H:2H multiply h1_{t-1}.
        w1s=jnp.vstack([wih1.T, whh1.T]).astype(bf16),       # (2H, 4H) bf16
        b1=(bih1 + bhh1).reshape(1, 4 * H),                  # (1, 4H) f32
        fc_w=fc_w_p.astype(bf16),                            # (H, Vp) bf16
        fc_b=fc_b_p,                                         # (1, Vp) f32
    )


# ----------------------------------------------------------------------------
# Forward wrapper (fused Pallas kernel).
# ----------------------------------------------------------------------------
@functools.partial(jax.jit, static_argnames=("vocab_len", "is_test"))
def rnn_model_forward(sentence, params, vocab_len, is_test=False):
    # Embedding lookup: data-dependent gather stays in plain JAX (glue).
    x = jnp.take(params["embed"], sentence.reshape(-1), axis=0).astype(jnp.bfloat16)
    S, E = x.shape
    H = params["whh0"].shape[0]
    Vp = params["fc_w"].shape[1]
    S_out = 1 if is_test else S

    vmem = pl.BlockSpec(memory_space=pltpu.MemorySpace.VMEM)

    flops = (2 * S * E * 4 * H             # layer-0 input projection
             + 2 * S * H * 4 * H           # layer-0 recurrence
             + 2 * S * 2 * H * 4 * H       # layer-1 fused projection + recurrence
             + 2 * S_out * H * Vp)         # fc
    transcendentals = 2 * S * 5 * H + S_out * (Vp + 1)
    bytes_accessed = (2 * (S * E + E * 4 * H + H * 4 * H + 2 * H * 4 * H + H * Vp)  # bf16
                      + 4 * (2 * 4 * H + Vp)                                        # f32 biases
                      + 4 * S_out * Vp)                                             # f32 output

    out_p = pl.pallas_call(
        functools.partial(rnn_fused_kernel, valid_v=vocab_len, is_test=is_test),
        out_shape=jax.ShapeDtypeStruct((S_out, Vp), jnp.float32),
        in_specs=[vmem] * 8,
        out_specs=vmem,
        scratch_shapes=[pltpu.VMEM((S, H), jnp.float32)],
        cost_estimate=pl.CostEstimate(flops=flops,
                                      transcendentals=transcendentals,
                                      bytes_accessed=bytes_accessed),
    )(x, params["wih0"], params["whh0"], params["b0"],
      params["w1s"], params["b1"], params["fc_w"], params["fc_b"])

    return out_p[:, :vocab_len]            # strip padded vocab lanes


# ----------------------------------------------------------------------------
# Pure-JAX reference (identical math / dtypes) for correctness checking.
# ----------------------------------------------------------------------------
@functools.partial(jax.jit, static_argnames=("vocab_len", "is_test"))
def rnn_model_reference(sentence, params, vocab_len, is_test=False):
    bf16, f32 = jnp.bfloat16, jnp.float32
    x = jnp.take(params["embed"], sentence.reshape(-1), axis=0).astype(bf16)
    S = x.shape[0]
    H = params["whh0"].shape[0]

    def cell(z, c):
        i = jax.nn.sigmoid(z[:, 0:H])
        f = jax.nn.sigmoid(z[:, H:2 * H])
        g = jnp.tanh(z[:, 2 * H:3 * H])
        o = jax.nn.sigmoid(z[:, 3 * H:4 * H])
        c = f * c + i * g
        return o * jnp.tanh(c), c

    z0 = jnp.dot(x, params["wih0"], preferred_element_type=f32) + params["b0"]
    h0 = jnp.zeros((1, H), f32)
    c0 = jnp.zeros((1, H), f32)
    h0_rows = []
    for t in range(S):
        z = z0[t:t + 1, :] + jnp.dot(h0.astype(bf16), params["whh0"],
                                     preferred_element_type=f32)
        h0, c0 = cell(z, c0)
        h0_rows.append(h0)

    h1 = jnp.zeros((1, H), f32)
    c1 = jnp.zeros((1, H), f32)
    h1_rows = []
    for t in range(S):
        x1 = jnp.concatenate([h0_rows[t], h1], axis=1).astype(bf16)
        z = params["b1"] + jnp.dot(x1, params["w1s"], preferred_element_type=f32)
        h1, c1 = cell(z, c1)
        h1_rows.append(h1)

    feats = h1_rows[-1] if is_test else jnp.concatenate(h1_rows, axis=0)
    logits = jnp.dot(feats.astype(bf16), params["fc_w"],
                     preferred_element_type=f32) + params["fc_b"]
    act = jnp.maximum(logits, 0.0)[:, :vocab_len]
    return jax.nn.log_softmax(act, axis=-1)


if __name__ == "__main__":
    key = jax.random.PRNGKey(0)
    k_param, k_sent = jax.random.split(key)

    vocab_len = 64
    embedding_dim = 32
    lstm_hidden_dim = 32
    seq_len = 8

    params = make_params(k_param, vocab_len, embedding_dim, lstm_hidden_dim)
    sentence = jax.random.randint(k_sent, (seq_len,), 0, vocab_len, jnp.int32)

    # Training-style path: all S rows.
    out = jax.block_until_ready(
        rnn_model_forward(sentence, params, vocab_len, is_test=False))
    assert out.shape == (seq_len, vocab_len)
    assert jnp.allclose(jnp.sum(jnp.exp(out), axis=-1), 1.0, atol=1e-4)

    ref = jax.block_until_ready(
        rnn_model_reference(sentence, params, vocab_len, is_test=False))
    assert jnp.allclose(out, ref, atol=5e-3, rtol=5e-3), \
        f"max abs err = {float(jnp.max(jnp.abs(out - ref)))}"

    # Inference path: last row only.
    pred = jax.block_until_ready(
        rnn_model_forward(sentence, params, vocab_len, is_test=True))
    assert pred.shape == (1, vocab_len)
    pred_ref = jax.block_until_ready(
        rnn_model_reference(sentence, params, vocab_len, is_test=True))
    assert jnp.allclose(pred, pred_ref, atol=5e-3, rtol=5e-3)

    print("KERNEL_OK")
</pallas_src>

<mosaic_0001>
module attributes {stable_mosaic.version = 11 : i64} {
  func.func @rnn_fused_kernel(%arg0: memref<8x32xbf16, #tpu.memory_space<vmem>>, %arg1: memref<32x128xbf16, #tpu.memory_space<vmem>>, %arg2: memref<32x128xbf16, #tpu.memory_space<vmem>>, %arg3: memref<1x128xf32, #tpu.memory_space<vmem>>, %arg4: memref<64x128xbf16, #tpu.memory_space<vmem>>, %arg5: memref<1x128xf32, #tpu.memory_space<vmem>>, %arg6: memref<32x128xbf16, #tpu.memory_space<vmem>>, %arg7: memref<1x128xf32, #tpu.memory_space<vmem>>, %arg8: memref<8x128xf32, #tpu.memory_space<vmem>>, %arg9: memref<8x32xf32, #tpu.memory_space<vmem>>) attributes {dimension_semantics = [], scalar_prefetch = 0 : i64, scratch_operands = 1 : i64, tpu.core_type = #tpu.core_type<tc>} {
    %c0 = arith.constant 0 : index
    %c0_0 = arith.constant 0 : index
    %0 = vector.load %arg2[%c0, %c0_0] : memref<32x128xbf16, #tpu.memory_space<vmem>>, vector<32x128xbf16>
    %c0_1 = arith.constant 0 : index
    %c0_2 = arith.constant 0 : index
    %1 = vector.load %arg4[%c0_1, %c0_2] : memref<64x128xbf16, #tpu.memory_space<vmem>>, vector<64x128xbf16>
    %c0_3 = arith.constant 0 : index
    %c0_4 = arith.constant 0 : index
    %2 = vector.load %arg5[%c0_3, %c0_4] : memref<1x128xf32, #tpu.memory_space<vmem>>, vector<1x128xf32>
    %c0_5 = arith.constant 0 : index
    %c0_6 = arith.constant 0 : index
    %3 = vector.load %arg0[%c0_5, %c0_6] : memref<8x32xbf16, #tpu.memory_space<vmem>>, vector<8x32xbf16>
    %c0_7 = arith.constant 0 : index
    %c0_8 = arith.constant 0 : index
    %4 = vector.load %arg1[%c0_7, %c0_8] : memref<32x128xbf16, #tpu.memory_space<vmem>>, vector<32x128xbf16>
    %cst = arith.constant dense<0.000000e+00> : vector<8x128xf32>
    %5 = tpu.matmul %3, %4, %cst {dimension_numbers = #tpu.dot_dimension_numbers<[1], [0], [0], [1], [0, 0, 1, 1], [], []>} : vector<8x32xbf16>, vector<32x128xbf16>, vector<8x128xf32> -> vector<8x128xf32>
    %c0_9 = arith.constant 0 : index
    %c0_10 = arith.constant 0 : index
    %6 = vector.load %arg3[%c0_9, %c0_10] : memref<1x128xf32, #tpu.memory_space<vmem>>, vector<1x128xf32>
    %7 = vector.broadcast %6 : vector<1x128xf32> to vector<8x128xf32>
    %8 = arith.addf %5, %7 : vector<8x128xf32>
    %cst_11 = arith.constant 0.000000e+00 : f32
    %9 = vector.broadcast %cst_11 : f32 to vector<1x32xf32>
    %cst_12 = arith.constant 0.000000e+00 : f32
    %10 = vector.broadcast %cst_12 : f32 to vector<1x32xf32>
    %cst_13 = arith.constant 0.000000e+00 : f32
    %11 = vector.broadcast %cst_13 : f32 to vector<1x32xf32>
    %cst_14 = arith.constant 0.000000e+00 : f32
    %12 = vector.broadcast %cst_14 : f32 to vector<1x32xf32>
    %13 = vector.extract_strided_slice %8 {offsets = [0, 0], sizes = [1, 128], strides = [1, 1]} : vector<8x128xf32> to vector<1x128xf32>
    %14 = arith.truncf %9 : vector<1x32xf32> to vector<1x32xbf16>
    %cst_15 = arith.constant dense<0.000000e+00> : vector<1x128xf32>
    %15 = tpu.matmul %14, %0, %cst_15 {dimension_numbers = #tpu.dot_dimension_numbers<[1], [0], [0], [1], [0, 0, 1, 1], [], []>} : vector<1x32xbf16>, vector<32x128xbf16>, vector<1x128xf32> -> vector<1x128xf32>
    %16 = arith.addf %13, %15 : vector<1x128xf32>
    %17 = vector.extract_strided_slice %16 {offsets = [0, 0], sizes = [1, 32], strides = [1, 1]} : vector<1x128xf32> to vector<1x32xf32>
    %18 = arith.negf %17 : vector<1x32xf32>
    %19 = math.exp %18 : vector<1x32xf32>
    %cst_16 = arith.constant 1.000000e+00 : f32
    %20 = vector.broadcast %cst_16 : f32 to vector<1x32xf32>
    %21 = arith.addf %20, %19 : vector<1x32xf32>
    %22 = arith.divf %20, %21 : vector<1x32xf32>
    %23 = vector.extract_strided_slice %16 {offsets = [0, 32], sizes = [1, 32], strides = [1, 1]} : vector<1x128xf32> to vector<1x32xf32>
    %24 = arith.negf %23 : vector<1x32xf32>
    %25 = math.exp %24 : vector<1x32xf32>
    %cst_17 = arith.constant 1.000000e+00 : f32
    %26 = vector.broadcast %cst_17 : f32 to vector<1x32xf32>
    %27 = arith.addf %26, %25 : vector<1x32xf32>
    %28 = arith.divf %26, %27 : vector<1x32xf32>
    %29 = vector.extract_strided_slice %16 {offsets = [0, 64], sizes = [1, 32], strides = [1, 1]} : vector<1x128xf32> to vector<1x32xf32>
    %30 = math.tanh %29 : vector<1x32xf32>
    %31 = vector.extract_strided_slice %16 {offsets = [0, 96], sizes = [1, 32], strides = [1, 1]} : vector<1x128xf32> to vector<1x32xf32>
    %32 = arith.negf %31 : vector<1x32xf32>
    %33 = math.exp %32 : vector<1x32xf32>
    %cst_18 = arith.constant 1.000000e+00 : f32
    %34 = vector.broadcast %cst_18 : f32 to vector<1x32xf32>
    %35 = arith.addf %34, %33 : vector<1x32xf32>
    %36 = arith.divf %34, %35 : vector<1x32xf32>
    %37 = arith.mulf %28, %10 : vector<1x32xf32>
    %38 = arith.mulf %22, %30 : vector<1x32xf32>
    %39 = arith.addf %37, %38 : vector<1x32xf32>
    %40 = math.tanh %39 : vector<1x32xf32>
    %41 = arith.mulf %36, %40 : vector<1x32xf32>
    %42 = vector.extract_strided_slice %8 {offsets = [1, 0], sizes = [1, 128], strides = [1, 1]} : vector<8x128xf32> to vector<1x128xf32>
    %43 = arith.truncf %41 : vector<1x32xf32> to vector<1x32xbf16>
    %cst_19 = arith.constant dense<0.000000e+00> : vector<1x128xf32>
    %44 = tpu.matmul %43, %0, %cst_19 {dimension_numbers = #tpu.dot_dimension_numbers<[1], [0], [0], [1], [0, 0, 1, 1], [], []>} : vector<1x32xbf16>, vector<32x128xbf16>, vector<1x128xf32> -> vector<1x128xf32>
    %45 = arith.addf %42, %44 : vector<1x128xf32>
    %46 = vector.extract_strided_slice %45 {offsets = [0, 0], sizes = [1, 32], strides = [1, 1]} : vector<1x128xf32> to vector<1x32xf32>
    %47 = arith.negf %46 : vector<1x32xf32>
    %48 = math.exp %47 : vector<1x32xf32>
    %cst_20 = arith.constant 1.000000e+00 : f32
    %49 = vector.broadcast %cst_20 : f32 to vector<1x32xf32>
    %50 = arith.addf %49, %48 : vector<1x32xf32>
    %51 = arith.divf %49, %50 : vector<1x32xf32>
    %52 = vector.extract_strided_slice %45 {offsets = [0, 32], sizes = [1, 32], strides = [1, 1]} : vector<1x128xf32> to vector<1x32xf32>
    %53 = arith.negf %52 : vector<1x32xf32>
    %54 = math.exp %53 : vector<1x32xf32>
    %cst_21 = arith.constant 1.000000e+00 : f32
    %55 = vector.broadcast %cst_21 : f32 to vector<1x32xf32>
    %56 = arith.addf %55, %54 : vector<1x32xf32>
    %57 = arith.divf %55, %56 : vector<1x32xf32>
    %58 = vector.extract_strided_slice %45 {offsets = [0, 64], sizes = [1, 32], strides = [1, 1]} : vector<1x128xf32> to vector<1x32xf32>
    %59 = math.tanh %58 : vector<1x32xf32>
    %60 = vector.extract_strided_slice %45 {offsets = [0, 96], sizes = [1, 32], strides = [1, 1]} : vector<1x128xf32> to vector<1x32xf32>
    %61 = arith.negf %60 : vector<1x32xf32>
    %62 = math.exp %61 : vector<1x32xf32>
    %cst_22 = arith.constant 1.000000e+00 : f32
    %63 = vector.broadcast %cst_22 : f32 to vector<1x32xf32>
    %64 = arith.addf %63, %62 : vector<1x32xf32>
    %65 = arith.divf %63, %64 : vector<1x32xf32>
    %66 = arith.mulf %57, %39 : vector<1x32xf32>
    %67 = arith.mulf %51, %59 : vector<1x32xf32>
    %68 = arith.addf %66, %67 : vector<1x32xf32>
    %69 = math.tanh %68 : vector<1x32xf32>
    %70 = arith.mulf %65, %69 : vector<1x32xf32>
    %71 = tpu.concatenate %41, %11 in 1 : vector<1x32xf32>, vector<1x32xf32> -> vector<1x64xf32>
    %72 = arith.truncf %71 : vector<1x64xf32> to vector<1x64xbf16>
    %cst_23 = arith.constant dense<0.000000e+00> : vector<1x128xf32>
    %73 = tpu.matmul %72, %1, %cst_23 {dimension_numbers = #tpu.dot_dimension_numbers<[1], [0], [0], [1], [0, 0, 1, 1], [], []>} : vector<1x64xbf16>, vector<64x128xbf16>, vector<1x128xf32> -> vector<1x128xf32>
    %74 = arith.addf %2, %73 : vector<1x128xf32>
    %75 = vector.extract_strided_slice %74 {offsets = [0, 0], sizes = [1, 32], strides = [1, 1]} : vector<1x128xf32> to vector<1x32xf32>
    %76 = arith.negf %75 : vector<1x32xf32>
    %77 = math.exp %76 : vector<1x32xf32>
    %cst_24 = arith.constant 1.000000e+00 : f32
    %78 = vector.broadcast %cst_24 : f32 to vector<1x32xf32>
    %79 = arith.addf %78, %77 : vector<1x32xf32>
    %80 = arith.divf %78, %79 : vector<1x32xf32>
    %81 = vector.extract_strided_slice %74 {offsets = [0, 32], sizes = [1, 32], strides = [1, 1]} : vector<1x128xf32> to vector<1x32xf32>
    %82 = arith.negf %81 : vector<1x32xf32>
    %83 = math.exp %82 : vector<1x32xf32>
    %cst_25 = arith.constant 1.000000e+00 : f32
    %84 = vector.broadcast %cst_25 : f32 to vector<1x32xf32>
    %85 = arith.addf %84, %83 : vector<1x32xf32>
    %86 = arith.divf %84, %85 : vector<1x32xf32>
    %87 = vector.extract_strided_slice %74 {offsets = [0, 64], sizes = [1, 32], strides = [1, 1]} : vector<1x128xf32> to vector<1x32xf32>
    %88 = math.tanh %87 : vector<1x32xf32>
    %89 = vector.extract_strided_slice %74 {offsets = [0, 96], sizes = [1, 32], strides = [1, 1]} : vector<1x128xf32> to vector<1x32xf32>
    %90 = arith.negf %89 : vector<1x32xf32>
    %91 = math.exp %90 : vector<1x32xf32>
    %cst_26 = arith.constant 1.000000e+00 : f32
    %92 = vector.broadcast %cst_26 : f32 to vector<1x32xf32>
    %93 = arith.addf %92, %91 : vector<1x32xf32>
    %94 = arith.divf %92, %93 : vector<1x32xf32>
    %95 = arith.mulf %86, %12 : vector<1x32xf32>
    %96 = arith.mulf %80, %88 : vector<1x32xf32>
    %97 = arith.addf %95, %96 : vector<1x32xf32>
    %98 = math.tanh %97 : vector<1x32xf32>
    %99 = arith.mulf %94, %98 : vector<1x32xf32>
    %c0_27 = arith.constant 0 : index
    %c0_28 = arith.constant 0 : index
    %100 = vector.load %arg9[%c0_27, %c0_28] : memref<8x32xf32, #tpu.memory_space<vmem>>, vector<1x32xf32>
    tpu.vector_store %arg9[%c0_27, %c0_28], %99 {strides = array<i32>} : memref<8x32xf32, #tpu.memory_space<vmem>>, vector<1x32xf32>,
    %101 = vector.extract_strided_slice %8 {offsets = [2, 0], sizes = [1, 128], strides = [1, 1]} : vector<8x128xf32> to vector<1x128xf32>
    %102 = arith.truncf %70 : vector<1x32xf32> to vector<1x32xbf16>
    %cst_29 = arith.constant dense<0.000000e+00> : vector<1x128xf32>
    %103 = tpu.matmul %102, %0, %cst_29 {dimension_numbers = #tpu.dot_dimension_numbers<[1], [0], [0], [1], [0, 0, 1, 1], [], []>} : vector<1x32xbf16>, vector<32x128xbf16>, vector<1x128xf32> -> vector<1x128xf32>
    %104 = arith.addf %101, %103 : vector<1x128xf32>
    %105 = vector.extract_strided_slice %104 {offsets = [0, 0], sizes = [1, 32], strides = [1, 1]} : vector<1x128xf32> to vector<1x32xf32>
    %106 = arith.negf %105 : vector<1x32xf32>
    %107 = math.exp %106 : vector<1x32xf32>
    %cst_30 = arith.constant 1.000000e+00 : f32
    %108 = vector.broadcast %cst_30 : f32 to vector<1x32xf32>
    %109 = arith.addf %108, %107 : vector<1x32xf32>
    %110 = arith.divf %108, %109 : vector<1x32xf32>
    %111 = vector.extract_strided_slice %104 {offsets = [0, 32], sizes = [1, 32], strides = [1, 1]} : vector<1x128xf32> to vector<1x32xf32>
    %112 = arith.negf %111 : vector<1x32xf32>
    %113 = math.exp %112 : vector<1x32xf32>
    %cst_31 = arith.constant 1.000000e+00 : f32
    %114 = vector.broadcast %cst_31 : f32 to vector<1x32xf32>
    %115 = arith.addf %114, %113 : vector<1x32xf32>
    %116 = arith.divf %114, %115 : vector<1x32xf32>
    %117 = vector.extract_strided_slice %104 {offsets = [0, 64], sizes = [1, 32], strides = [1, 1]} : vector<1x128xf32> to vector<1x32xf32>
    %118 = math.tanh %117 : vector<1x32xf32>
    %119 = vector.extract_strided_slice %104 {offsets = [0, 96], sizes = [1, 32], strides = [1, 1]} : vector<1x128xf32> to vector<1x32xf32>
    %120 = arith.negf %119 : vector<1x32xf32>
    %121 = math.exp %120 : vector<1x32xf32>
    %cst_32 = arith.constant 1.000000e+00 : f32
    %122 = vector.broadcast %cst_32 : f32 to vector<1x32xf32>
    %123 = arith.addf %122, %121 : vector<1x32xf32>
    %124 = arith.divf %122, %123 : vector<1x32xf32>
    %125 = arith.mulf %116, %68 : vector<1x32xf32>
    %126 = arith.mulf %110, %118 : vector<1x32xf32>
    %127 = arith.addf %125, %126 : vector<1x32xf32>
    %128 = math.tanh %127 : vector<1x32xf32>
    %129 = arith.mulf %124, %128 : vector<1x32xf32>
    %130 = tpu.concatenate %70, %99 in 1 : vector<1x32xf32>, vector<1x32xf32> -> vector<1x64xf32>
    %131 = arith.truncf %130 : vector<1x64xf32> to vector<1x64xbf16>
    %cst_33 = arith.constant dense<0.000000e+00> : vector<1x128xf32>
    %132 = tpu.matmul %131, %1, %cst_33 {dimension_numbers = #tpu.dot_dimension_numbers<[1], [0], [0], [1], [0, 0, 1, 1], [], []>} : vector<1x64xbf16>, vector<64x128xbf16>, vector<1x128xf32> -> vector<1x128xf32>
    %133 = arith.addf %2, %132 : vector<1x128xf32>
    %134 = vector.extract_strided_slice %133 {offsets = [0, 0], sizes = [1, 32], strides = [1, 1]} : vector<1x128xf32> to vector<1x32xf32>
    %135 = arith.negf %134 : vector<1x32xf32>
    %136 = math.exp %135 : vector<1x32xf32>
    %cst_34 = arith.constant 1.000000e+00 : f32
    %137 = vector.broadcast %cst_34 : f32 to vector<1x32xf32>
    %138 = arith.addf %137, %136 : vector<1x32xf32>
    %139 = arith.divf %137, %138 : vector<1x32xf32>
    %140 = vector.extract_strided_slice %133 {offsets = [0, 32], sizes = [1, 32], strides = [1, 1]} : vector<1x128xf32> to vector<1x32xf32>
    %141 = arith.negf %140 : vector<1x32xf32>
    %142 = math.exp %141 : vector<1x32xf32>
    %cst_35 = arith.constant 1.000000e+00 : f32
    %143 = vector.broadcast %cst_35 : f32 to vector<1x32xf32>
    %144 = arith.addf %143, %142 : vector<1x32xf32>
    %145 = arith.divf %143, %144 : vector<1x32xf32>
    %146 = vector.extract_strided_slice %133 {offsets = [0, 64], sizes = [1, 32], strides = [1, 1]} : vector<1x128xf32> to vector<1x32xf32>
    %147 = math.tanh %146 : vector<1x32xf32>
    %148 = vector.extract_strided_slice %133 {offsets = [0, 96], sizes = [1, 32], strides = [1, 1]} : vector<1x128xf32> to vector<1x32xf32>
    %149 = arith.negf %148 : vector<1x32xf32>
    %150 = math.exp %149 : vector<1x32xf32>
    %cst_36 = arith.constant 1.000000e+00 : f32
    %151 = vector.broadcast %cst_36 : f32 to vector<1x32xf32>
    %152 = arith.addf %151, %150 : vector<1x32xf32>
    %153 = arith.divf %151, %152 : vector<1x32xf32>
    %154 = arith.mulf %145, %97 : vector<1x32xf32>
    %155 = arith.mulf %139, %147 : vector<1x32xf32>
    %156 = arith.addf %154, %155 : vector<1x32xf32>
    %157 = math.tanh %156 : vector<1x32xf32>
    %158 = arith.mulf %153, %157 : vector<1x32xf32>
    %c1 = arith.constant 1 : index
    %c0_37 = arith.constant 0 : index
    %159 = vector.load %arg9[%c1, %c0_37] : memref<8x32xf32, #tpu.memory_space<vmem>>, vector<1x32xf32>
    tpu.vector_store %arg9[%c1, %c0_37], %158 {strides = array<i32>} : memref<8x32xf32, #tpu.memory_space<vmem>>, vector<1x32xf32>,
    %160 = vector.extract_strided_slice %8 {offsets = [3, 0], sizes = [1, 128], strides = [1, 1]} : vector<8x128xf32> to vector<1x128xf32>
    %161 = arith.truncf %129 : vector<1x32xf32> to vector<1x32xbf16>
    %cst_38 = arith.constant dense<0.000000e+00> : vector<1x128xf32>
    %162 = tpu.matmul %161, %0, %cst_38 {dimension_numbers = #tpu.dot_dimension_numbers<[1], [0], [0], [1], [0, 0, 1, 1], [], []>} : vector<1x32xbf16>, vector<32x128xbf16>, vector<1x128xf32> -> vector<1x128xf32>
    %163 = arith.addf %160, %162 : vector<1x128xf32>
    %164 = vector.extract_strided_slice %163 {offsets = [0, 0], sizes = [1, 32], strides = [1, 1]} : vector<1x128xf32> to vector<1x32xf32>
    %165 = arith.negf %164 : vector<1x32xf32>
    %166 = math.exp %165 : vector<1x32xf32>
    %cst_39 = arith.constant 1.000000e+00 : f32
    %167 = vector.broadcast %cst_39 : f32 to vector<1x32xf32>
    %168 = arith.addf %167, %166 : vector<1x32xf32>
    %169 = arith.divf %167, %168 : vector<1x32xf32>
    %170 = vector.extract_strided_slice %163 {offsets = [0, 32], sizes = [1, 32], strides = [1, 1]} : vector<1x128xf32> to vector<1x32xf32>
    %171 = arith.negf %170 : vector<1x32xf32>
    %172 = math.exp %171 : vector<1x32xf32>
    %cst_40 = arith.constant 1.000000e+00 : f32
    %173 = vector.broadcast %cst_40 : f32 to vector<1x32xf32>
    %174 = arith.addf %173, %172 : vector<1x32xf32>
    %175 = arith.divf %173, %174 : vector<1x32xf32>
    %176 = vector.extract_strided_slice %163 {offsets = [0, 64], sizes = [1, 32], strides = [1, 1]} : vector<1x128xf32> to vector<1x32xf32>
    %177 = math.tanh %176 : vector<1x32xf32>
    %178 = vector.extract_strided_slice %163 {offsets = [0, 96], sizes = [1, 32], strides = [1, 1]} : vector<1x128xf32> to vector<1x32xf32>
    %179 = arith.negf %178 : vector<1x32xf32>
    %180 = math.exp %179 : vector<1x32xf32>
    %cst_41 = arith.constant 1.000000e+00 : f32
    %181 = vector.broadcast %cst_41 : f32 to vector<1x32xf32>
    %182 = arith.addf %181, %180 : vector<1x32xf32>
    %183 = arith.divf %181, %182 : vector<1x32xf32>
    %184 = arith.mulf %175, %127 : vector<1x32xf32>
    %185 = arith.mulf %169, %177 : vector<1x32xf32>
    %186 = arith.addf %184, %185 : vector<1x32xf32>
    %187 = math.tanh %186 : vector<1x32xf32>
    %188 = arith.mulf %183, %187 : vector<1x32xf32>
    %189 = tpu.concatenate %129, %158 in 1 : vector<1x32xf32>, vector<1x32xf32> -> vector<1x64xf32>
    %190 = arith.truncf %189 : vector<1x64xf32> to vector<1x64xbf16>
    %cst_42 = arith.constant dense<0.000000e+00> : vector<1x128xf32>
    %191 = tpu.matmul %190, %1, %cst_42 {dimension_numbers = #tpu.dot_dimension_numbers<[1], [0], [0], [1], [0, 0, 1, 1], [], []>} : vector<1x64xbf16>, vector<64x128xbf16>, vector<1x128xf32> -> vector<1x128xf32>
    %192 = arith.addf %2, %191 : vector<1x128xf32>
    %193 = vector.extract_strided_slice %192 {offsets = [0, 0], sizes = [1, 32], strides = [1, 1]} : vector<1x128xf32> to vector<1x32xf32>
    %194 = arith.negf %193 : vector<1x32xf32>
    %195 = math.exp %194 : vector<1x32xf32>
    %cst_43 = arith.constant 1.000000e+00 : f32
    %196 = vector.broadcast %cst_43 : f32 to vector<1x32xf32>
    %197 = arith.addf %196, %195 : vector<1x32xf32>
    %198 = arith.divf %196, %197 : vector<1x32xf32>
    %199 = vector.extract_strided_slice %192 {offsets = [0, 32], sizes = [1, 32], strides = [1, 1]} : vector<1x128xf32> to vector<1x32xf32>
    %200 = arith.negf %199 : vector<1x32xf32>
    %201 = math.exp %200 : vector<1x32xf32>
    %cst_44 = arith.constant 1.000000e+00 : f32
    %202 = vector.broadcast %cst_44 : f32 to vector<1x32xf32>
    %203 = arith.addf %202, %201 : vector<1x32xf32>
    %204 = arith.divf %202, %203 : vector<1x32xf32>
    %205 = vector.extract_strided_slice %192 {offsets = [0, 64], sizes = [1, 32], strides = [1, 1]} : vector<1x128xf32> to vector<1x32xf32>
    %206 = math.tanh %205 : vector<1x32xf32>
    %207 = vector.extract_strided_slice %192 {offsets = [0, 96], sizes = [1, 32], strides = [1, 1]} : vector<1x128xf32> to vector<1x32xf32>
    %208 = arith.negf %207 : vector<1x32xf32>
    %209 = math.exp %208 : vector<1x32xf32>
    %cst_45 = arith.constant 1.000000e+00 : f32
    %210 = vector.broadcast %cst_45 : f32 to vector<1x32xf32>
    %211 = arith.addf %210, %209 : vector<1x32xf32>
    %212 = arith.divf %210, %211 : vector<1x32xf32>
    %213 = arith.mulf %204, %156 : vector<1x32xf32>
    %214 = arith.mulf %198, %206 : vector<1x32xf32>
    %215 = arith.addf %213, %214 : vector<1x32xf32>
    %216 = math.tanh %215 : vector<1x32xf32>
    %217 = arith.mulf %212, %216 : vector<1x32xf32>
    %c2 = arith.constant 2 : index
    %c0_46 = arith.constant 0 : index
    %218 = vector.load %arg9[%c2, %c0_46] : memref<8x32xf32, #tpu.memory_space<vmem>>, vector<1x32xf32>
    tpu.vector_store %arg9[%c2, %c0_46], %217 {strides = array<i32>} : memref<8x32xf32, #tpu.memory_space<vmem>>, vector<1x32xf32>,
    %219 = vector.extract_strided_slice %8 {offsets = [4, 0], sizes = [1, 128], strides = [1, 1]} : vector<8x128xf32> to vector<1x128xf32>
    %220 = arith.truncf %188 : vector<1x32xf32> to vector<1x32xbf16>
    %cst_47 = arith.constant dense<0.000000e+00> : vector<1x128xf32>
    %221 = tpu.matmul %220, %0, %cst_47 {dimension_numbers = #tpu.dot_dimension_numbers<[1], [0], [0], [1], [0, 0, 1, 1], [], []>} : vector<1x32xbf16>, vector<32x128xbf16>, vector<1x128xf32> -> vector<1x128xf32>
    %222 = arith.addf %219, %221 : vector<1x128xf32>
    %223 = vector.extract_strided_slice %222 {offsets = [0, 0], sizes = [1, 32], strides = [1, 1]} : vector<1x128xf32> to vector<1x32xf32>
    %224 = arith.negf %223 : vector<1x32xf32>
    %225 = math.exp %224 : vector<1x32xf32>
    %cst_48 = arith.constant 1.000000e+00 : f32
    %226 = vector.broadcast %cst_48 : f32 to vector<1x32xf32>
    %227 = arith.addf %226, %225 : vector<1x32xf32>
    %228 = arith.divf %226, %227 : vector<1x32xf32>
    %229 = vector.extract_strided_slice %222 {offsets = [0, 32], sizes = [1, 32], strides = [1, 1]} : vector<1x128xf32> to vector<1x32xf32>
    %230 = arith.negf %229 : vector<1x32xf32>
    %231 = math.exp %230 : vector<1x32xf32>
    %cst_49 = arith.constant 1.000000e+00 : f32
    %232 = vector.broadcast %cst_49 : f32 to vector<1x32xf32>
    %233 = arith.addf %232, %231 : vector<1x32xf32>
    %234 = arith.divf %232, %233 : vector<1x32xf32>
    %235 = vector.extract_strided_slice %222 {offsets = [0, 64], sizes = [1, 32], strides = [1, 1]} : vector<1x128xf32> to vector<1x32xf32>
    %236 = math.tanh %235 : vector<1x32xf32>
    %237 = vector.extract_strided_slice %222 {offsets = [0, 96], sizes = [1, 32], strides = [1, 1]} : vector<1x128xf32> to vector<1x32xf32>
    %238 = arith.negf %237 : vector<1x32xf32>
    %239 = math.exp %238 : vector<1x32xf32>
    %cst_50 = arith.constant 1.000000e+00 : f32
    %240 = vector.broadcast %cst_50 : f32 to vector<1x32xf32>
    %241 = arith.addf %240, %239 : vector<1x32xf32>
    %242 = arith.divf %240, %241 : vector<1x32xf32>
    %243 = arith.mulf %234, %186 : vector<1x32xf32>
    %244 = arith.mulf %228, %236 : vector<1x32xf32>
    %245 = arith.addf %243, %244 : vector<1x32xf32>
    %246 = math.tanh %245 : vector<1x32xf32>
    %247 = arith.mulf %242, %246 : vector<1x32xf32>
    %248 = tpu.concatenate %188, %217 in 1 : vector<1x32xf32>, vector<1x32xf32> -> vector<1x64xf32>
    %249 = arith.truncf %248 : vector<1x64xf32> to vector<1x64xbf16>
    %cst_51 = arith.constant dense<0.000000e+00> : vector<1x128xf32>
    %250 = tpu.matmul %249, %1, %cst_51 {dimension_numbers = #tpu.dot_dimension_numbers<[1], [0], [0], [1], [0, 0, 1, 1], [], []>} : vector<1x64xbf16>, vector<64x128xbf16>, vector<1x128xf32> -> vector<1x128xf32>
    %251 = arith.addf %2, %250 : vector<1x128xf32>
    %252 = vector.extract_strided_slice %251 {offsets = [0, 0], sizes = [1, 32], strides = [1, 1]} : vector<1x128xf32> to vector<1x32xf32>
    %253 = arith.negf %252 : vector<1x32xf32>
    %254 = math.exp %253 : vector<1x32xf32>
    %cst_52 = arith.constant 1.000000e+00 : f32
    %255 = vector.broadcast %cst_52 : f32 to vector<1x32xf32>
    %256 = arith.addf %255, %254 : vector<1x32xf32>
    %257 = arith.divf %255, %256 : vector<1x32xf32>
    %258 = vector.extract_strided_slice %251 {offsets = [0, 32], sizes = [1, 32], strides = [1, 1]} : vector<1x128xf32> to vector<1x32xf32>
    %259 = arith.negf %258 : vector<1x32xf32>
    %260 = math.exp %259 : vector<1x32xf32>
    %cst_53 = arith.constant 1.000000e+00 : f32
    %261 = vector.broadcast %cst_53 : f32 to vector<1x32xf32>
    %262 = arith.addf %261, %260 : vector<1x32xf32>
    %263 = arith.divf %261, %262 : vector<1x32xf32>
    %264 = vector.extract_strided_slice %251 {offsets = [0, 64], sizes = [1, 32], strides = [1, 1]} : vector<1x128xf32> to vector<1x32xf32>
    %265 = math.tanh %264 : vector<1x32xf32>
    %266 = vector.extract_strided_slice %251 {offsets = [0, 96], sizes = [1, 32], strides = [1, 1]} : vector<1x128xf32> to vector<1x32xf32>
    %267 = arith.negf %266 : vector<1x32xf32>
    %268 = math.exp %267 : vector<1x32xf32>
    %cst_54 = arith.constant 1.000000e+00 : f32
    %269 = vector.broadcast %cst_54 : f32 to vector<1x32xf32>
    %270 = arith.addf %269, %268 : vector<1x32xf32>
    %271 = arith.divf %269, %270 : vector<1x32xf32>
    %272 = arith.mulf %263, %215 : vector<1x32xf32>
    %273 = arith.mulf %257, %265 : vector<1x32xf32>
    %274 = arith.addf %272, %273 : vector<1x32xf32>
    %275 = math.tanh %274 : vector<1x32xf32>
    %276 = arith.mulf %271, %275 : vector<1x32xf32>
    %c3 = arith.constant 3 : index
    %c0_55 = arith.constant 0 : index
    %277 = vector.load %arg9[%c3, %c0_55] : memref<8x32xf32, #tpu.memory_space<vmem>>, vector<1x32xf32>
    tpu.vector_store %arg9[%c3, %c0_55], %276 {strides = array<i32>} : memref<8x32xf32, #tpu.memory_space<vmem>>, vector<1x32xf32>,
    %278 = vector.extract_strided_slice %8 {offsets = [5, 0], sizes = [1, 128], strides = [1, 1]} : vector<8x128xf32> to vector<1x128xf32>
    %279 = arith.truncf %247 : vector<1x32xf32> to vector<1x32xbf16>
    %cst_56 = arith.constant dense<0.000000e+00> : vector<1x128xf32>
    %280 = tpu.matmul %279, %0, %cst_56 {dimension_numbers = #tpu.dot_dimension_numbers<[1], [0], [0], [1], [0, 0, 1, 1], [], []>} : vector<1x32xbf16>, vector<32x128xbf16>, vector<1x128xf32> -> vector<1x128xf32>
    %281 = arith.addf %278, %280 : vector<1x128xf32>
    %282 = vector.extract_strided_slice %281 {offsets = [0, 0], sizes = [1, 32], strides = [1, 1]} : vector<1x128xf32> to vector<1x32xf32>
    %283 = arith.negf %282 : vector<1x32xf32>
    %284 = math.exp %283 : vector<1x32xf32>
    %cst_57 = arith.constant 1.000000e+00 : f32
    %285 = vector.broadcast %cst_57 : f32 to vector<1x32xf32>
    %286 = arith.addf %285, %284 : vector<1x32xf32>
    %287 = arith.divf %285, %286 : vector<1x32xf32>
    %288 = vector.extract_strided_slice %281 {offsets = [0, 32], sizes = [1, 32], strides = [1, 1]} : vector<1x128xf32> to vector<1x32xf32>
    %289 = arith.negf %288 : vector<1x32xf32>
    %290 = math.exp %289 : vector<1x32xf32>
    %cst_58 = arith.constant 1.000000e+00 : f32
    %291 = vector.broadcast %cst_58 : f32 to vector<1x32xf32>
    %292 = arith.addf %291, %290 : vector<1x32xf32>
    %293 = arith.divf %291, %292 : vector<1x32xf32>
    %294 = vector.extract_strided_slice %281 {offsets = [0, 64], sizes = [1, 32], strides = [1, 1]} : vector<1x128xf32> to vector<1x32xf32>
    %295 = math.tanh %294 : vector<1x32xf32>
    %296 = vector.extract_strided_slice %281 {offsets = [0, 96], sizes = [1, 32], strides = [1, 1]} : vector<1x128xf32> to vector<1x32xf32>
    %297 = arith.negf %296 : vector<1x32xf32>
    %298 = math.exp %297 : vector<1x32xf32>
    %cst_59 = arith.constant 1.000000e+00 : f32
    %299 = vector.broadcast %cst_59 : f32 to vector<1x32xf32>
    %300 = arith.addf %299, %298 : vector<1x32xf32>
    %301 = arith.divf %299, %300 : vector<1x32xf32>
    %302 = arith.mulf %293, %245 : vector<1x32xf32>
    %303 = arith.mulf %287, %295 : vector<1x32xf32>
    %304 = arith.addf %302, %303 : vector<1x32xf32>
    %305 = math.tanh %304 : vector<1x32xf32>
    %306 = arith.mulf %301, %305 : vector<1x32xf32>
    %307 = tpu.concatenate %247, %276 in 1 : vector<1x32xf32>, vector<1x32xf32> -> vector<1x64xf32>
    %308 = arith.truncf %307 : vector<1x64xf32> to vector<1x64xbf16>
    %cst_60 = arith.constant dense<0.000000e+00> : vector<1x128xf32>
    %309 = tpu.matmul %308, %1, %cst_60 {dimension_numbers = #tpu.dot_dimension_numbers<[1], [0], [0], [1], [0, 0, 1, 1], [], []>} : vector<1x64xbf16>, vector<64x128xbf16>, vector<1x128xf32> -> vector<1x128xf32>
    %310 = arith.addf %2, %309 : vector<1x128xf32>
    %311 = vector.extract_strided_slice %310 {offsets = [0, 0], sizes = [1, 32], strides = [1, 1]} : vector<1x128xf32> to vector<1x32xf32>
    %312 = arith.negf %311 : vector<1x32xf32>
    %313 = math.exp %312 : vector<1x32xf32>
    %cst_61 = arith.constant 1.000000e+00 : f32
    %314 = vector.broadcast %cst_61 : f32 to vector<1x32xf32>
    %315 = arith.addf %314, %313 : vector<1x32xf32>
    %316 = arith.divf %314, %315 : vector<1x32xf32>
    %317 = vector.extract_strided_slice %310 {offsets = [0, 32], sizes = [1, 32], strides = [1, 1]} : vector<1x128xf32> to vector<1x32xf32>
    %318 = arith.negf %317 : vector<1x32xf32>
    %319 = math.exp %318 : vector<1x32xf32>
    %cst_62 = arith.constant 1.000000e+00 : f32
    %320 = vector.broadcast %cst_62 : f32 to vector<1x32xf32>
    %321 = arith.addf %320, %319 : vector<1x32xf32>
    %322 = arith.divf %320, %321 : vector<1x32xf32>
    %323 = vector.extract_strided_slice %310 {offsets = [0, 64], sizes = [1, 32], strides = [1, 1]} : vector<1x128xf32> to vector<1x32xf32>
    %324 = math.tanh %323 : vector<1x32xf32>
    %325 = vector.extract_strided_slice %310 {offsets = [0, 96], sizes = [1, 32], strides = [1, 1]} : vector<1x128xf32> to vector<1x32xf32>
    %326 = arith.negf %325 : vector<1x32xf32>
    %327 = math.exp %326 : vector<1x32xf32>
    %cst_63 = arith.constant 1.000000e+00 : f32
    %328 = vector.broadcast %cst_63 : f32 to vector<1x32xf32>
    %329 = arith.addf %328, %327 : vector<1x32xf32>
    %330 = arith.divf %328, %329 : vector<1x32xf32>
    %331 = arith.mulf %322, %274 : vector<1x32xf32>
    %332 = arith.mulf %316, %324 : vector<1x32xf32>
    %333 = arith.addf %331, %332 : vector<1x32xf32>
    %334 = math.tanh %333 : vector<1x32xf32>
    %335 = arith.mulf %330, %334 : vector<1x32xf32>
    %c4 = arith.constant 4 : index
    %c0_64 = arith.constant 0 : index
    %336 = vector.load %arg9[%c4, %c0_64] : memref<8x32xf32, #tpu.memory_space<vmem>>, vector<1x32xf32>
    tpu.vector_store %arg9[%c4, %c0_64], %335 {strides = array<i32>} : memref<8x32xf32, #tpu.memory_space<vmem>>, vector<1x32xf32>,
    %337 = vector.extract_strided_slice %8 {offsets = [6, 0], sizes = [1, 128], strides = [1, 1]} : vector<8x128xf32> to vector<1x128xf32>
    %338 = arith.truncf %306 : vector<1x32xf32> to vector<1x32xbf16>
    %cst_65 = arith.constant dense<0.000000e+00> : vector<1x128xf32>
    %339 = tpu.matmul %338, %0, %cst_65 {dimension_numbers = #tpu.dot_dimension_numbers<[1], [0], [0], [1], [0, 0, 1, 1], [], []>} : vector<1x32xbf16>, vector<32x128xbf16>, vector<1x128xf32> -> vector<1x128xf32>
    %340 = arith.addf %337, %339 : vector<1x128xf32>
    %341 = vector.extract_strided_slice %340 {offsets = [0, 0], sizes = [1, 32], strides = [1, 1]} : vector<1x128xf32> to vector<1x32xf32>
    %342 = arith.negf %341 : vector<1x32xf32>
    %343 = math.exp %342 : vector<1x32xf32>
    %cst_66 = arith.constant 1.000000e+00 : f32
    %344 = vector.broadcast %cst_66 : f32 to vector<1x32xf32>
    %345 = arith.addf %344, %343 : vector<1x32xf32>
    %346 = arith.divf %344, %345 : vector<1x32xf32>
    %347 = vector.extract_strided_slice %340 {offsets = [0, 32], sizes = [1, 32], strides = [1, 1]} : vector<1x128xf32> to vector<1x32xf32>
    %348 = arith.negf %347 : vector<1x32xf32>
    %349 = math.exp %348 : vector<1x32xf32>
    %cst_67 = arith.constant 1.000000e+00 : f32
    %350 = vector.broadcast %cst_67 : f32 to vector<1x32xf32>
    %351 = arith.addf %350, %349 : vector<1x32xf32>
    %352 = arith.divf %350, %351 : vector<1x32xf32>
    %353 = vector.extract_strided_slice %340 {offsets = [0, 64], sizes = [1, 32], strides = [1, 1]} : vector<1x128xf32> to vector<1x32xf32>
    %354 = math.tanh %353 : vector<1x32xf32>
    %355 = vector.extract_strided_slice %340 {offsets = [0, 96], sizes = [1, 32], strides = [1, 1]} : vector<1x128xf32> to vector<1x32xf32>
    %356 = arith.negf %355 : vector<1x32xf32>
    %357 = math.exp %356 : vector<1x32xf32>
    %cst_68 = arith.constant 1.000000e+00 : f32
    %358 = vector.broadcast %cst_68 : f32 to vector<1x32xf32>
    %359 = arith.addf %358, %357 : vector<1x32xf32>
    %360 = arith.divf %358, %359 : vector<1x32xf32>
    %361 = arith.mulf %352, %304 : vector<1x32xf32>
    %362 = arith.mulf %346, %354 : vector<1x32xf32>
    %363 = arith.addf %361, %362 : vector<1x32xf32>
    %364 = math.tanh %363 : vector<1x32xf32>
    %365 = arith.mulf %360, %364 : vector<1x32xf32>
    %366 = tpu.concatenate %306, %335 in 1 : vector<1x32xf32>, vector<1x32xf32> -> vector<1x64xf32>
    %367 = arith.truncf %366 : vector<1x64xf32> to vector<1x64xbf16>
    %cst_69 = arith.constant dense<0.000000e+00> : vector<1x128xf32>
    %368 = tpu.matmul %367, %1, %cst_69 {dimension_numbers = #tpu.dot_dimension_numbers<[1], [0], [0], [1], [0, 0, 1, 1], [], []>} : vector<1x64xbf16>, vector<64x128xbf16>, vector<1x128xf32> -> vector<1x128xf32>
    %369 = arith.addf %2, %368 : vector<1x128xf32>
    %370 = vector.extract_strided_slice %369 {offsets = [0, 0], sizes = [1, 32], strides = [1, 1]} : vector<1x128xf32> to vector<1x32xf32>
    %371 = arith.negf %370 : vector<1x32xf32>
    %372 = math.exp %371 : vector<1x32xf32>
    %cst_70 = arith.constant 1.000000e+00 : f32
    %373 = vector.broadcast %cst_70 : f32 to vector<1x32xf32>
    %374 = arith.addf %373, %372 : vector<1x32xf32>
    %375 = arith.divf %373, %374 : vector<1x32xf32>
    %376 = vector.extract_strided_slice %369 {offsets = [0, 32], sizes = [1, 32], strides = [1, 1]} : vector<1x128xf32> to vector<1x32xf32>
    %377 = arith.negf %376 : vector<1x32xf32>
    %378 = math.exp %377 : vector<1x32xf32>
    %cst_71 = arith.constant 1.000000e+00 : f32
    %379 = vector.broadcast %cst_71 : f32 to vector<1x32xf32>
    %380 = arith.addf %379, %378 : vector<1x32xf32>
    %381 = arith.divf %379, %380 : vector<1x32xf32>
    %382 = vector.extract_strided_slice %369 {offsets = [0, 64], sizes = [1, 32], strides = [1, 1]} : vector<1x128xf32> to vector<1x32xf32>
    %383 = math.tanh %382 : vector<1x32xf32>
    %384 = vector.extract_strided_slice %369 {offsets = [0, 96], sizes = [1, 32], strides = [1, 1]} : vector<1x128xf32> to vector<1x32xf32>
    %385 = arith.negf %384 : vector<1x32xf32>
    %386 = math.exp %385 : vector<1x32xf32>
    %cst_72 = arith.constant 1.000000e+00 : f32
    %387 = vector.broadcast %cst_72 : f32 to vector<1x32xf32>
    %388 = arith.addf %387, %386 : vector<1x32xf32>
    %389 = arith.divf %387, %388 : vector<1x32xf32>
    %390 = arith.mulf %381, %333 : vector<1x32xf32>
    %391 = arith.mulf %375, %383 : vector<1x32xf32>
    %392 = arith.addf %390, %391 : vector<1x32xf32>
    %393 = math.tanh %392 : vector<1x32xf32>
    %394 = arith.mulf %389, %393 : vector<1x32xf32>
    %c5 = arith.constant 5 : index
    %c0_73 = arith.constant 0 : index
    %395 = vector.load %arg9[%c5, %c0_73] : memref<8x32xf32, #tpu.memory_space<vmem>>, vector<1x32xf32>
    tpu.vector_store %arg9[%c5, %c0_73], %394 {strides = array<i32>} : memref<8x32xf32, #tpu.memory_space<vmem>>, vector<1x32xf32>,
    %396 = vector.extract_strided_slice %8 {offsets = [7, 0], sizes = [1, 128], strides = [1, 1]} : vector<8x128xf32> to vector<1x128xf32>
    %397 = arith.truncf %365 : vector<1x32xf32> to vector<1x32xbf16>
    %cst_74 = arith.constant dense<0.000000e+00> : vector<1x128xf32>
    %398 = tpu.matmul %397, %0, %cst_74 {dimension_numbers = #tpu.dot_dimension_numbers<[1], [0], [0], [1], [0, 0, 1, 1], [], []>} : vector<1x32xbf16>, vector<32x128xbf16>, vector<1x128xf32> -> vector<1x128xf32>
    %399 = arith.addf %396, %398 : vector<1x128xf32>
    %400 = vector.extract_strided_slice %399 {offsets = [0, 0], sizes = [1, 32], strides = [1, 1]} : vector<1x128xf32> to vector<1x32xf32>
    %401 = arith.negf %400 : vector<1x32xf32>
    %402 = math.exp %401 : vector<1x32xf32>
    %cst_75 = arith.constant 1.000000e+00 : f32
    %403 = vector.broadcast %cst_75 : f32 to vector<1x32xf32>
    %404 = arith.addf %403, %402 : vector<1x32xf32>
    %405 = arith.divf %403, %404 : vector<1x32xf32>
    %406 = vector.extract_strided_slice %399 {offsets = [0, 32], sizes = [1, 32], strides = [1, 1]} : vector<1x128xf32> to vector<1x32xf32>
    %407 = arith.negf %406 : vector<1x32xf32>
    %408 = math.exp %407 : vector<1x32xf32>
    %cst_76 = arith.constant 1.000000e+00 : f32
    %409 = vector.broadcast %cst_76 : f32 to vector<1x32xf32>
    %410 = arith.addf %409, %408 : vector<1x32xf32>
    %411 = arith.divf %409, %410 : vector<1x32xf32>
    %412 = vector.extract_strided_slice %399 {offsets = [0, 64], sizes = [1, 32], strides = [1, 1]} : vector<1x128xf32> to vector<1x32xf32>
    %413 = math.tanh %412 : vector<1x32xf32>
    %414 = vector.extract_strided_slice %399 {offsets = [0, 96], sizes = [1, 32], strides = [1, 1]} : vector<1x128xf32> to vector<1x32xf32>
    %415 = arith.negf %414 : vector<1x32xf32>
    %416 = math.exp %415 : vector<1x32xf32>
    %cst_77 = arith.constant 1.000000e+00 : f32
    %417 = vector.broadcast %cst_77 : f32 to vector<1x32xf32>
    %418 = arith.addf %417, %416 : vector<1x32xf32>
    %419 = arith.divf %417, %418 : vector<1x32xf32>
    %420 = arith.mulf %411, %363 : vector<1x32xf32>
    %421 = arith.mulf %405, %413 : vector<1x32xf32>
    %422 = arith.addf %420, %421 : vector<1x32xf32>
    %423 = math.tanh %422 : vector<1x32xf32>
    %424 = arith.mulf %419, %423 : vector<1x32xf32>
    %425 = tpu.concatenate %365, %394 in 1 : vector<1x32xf32>, vector<1x32xf32> -> vector<1x64xf32>
    %426 = arith.truncf %425 : vector<1x64xf32> to vector<1x64xbf16>
    %cst_78 = arith.constant dense<0.000000e+00> : vector<1x128xf32>
    %427 = tpu.matmul %426, %1, %cst_78 {dimension_numbers = #tpu.dot_dimension_numbers<[1], [0], [0], [1], [0, 0, 1, 1], [], []>} : vector<1x64xbf16>, vector<64x128xbf16>, vector<1x128xf32> -> vector<1x128xf32>
    %428 = arith.addf %2, %427 : vector<1x128xf32>
    %429 = vector.extract_strided_slice %428 {offsets = [0, 0], sizes = [1, 32], strides = [1, 1]} : vector<1x128xf32> to vector<1x32xf32>
    %430 = arith.negf %429 : vector<1x32xf32>
    %431 = math.exp %430 : vector<1x32xf32>
    %cst_79 = arith.constant 1.000000e+00 : f32
    %432 = vector.broadcast %cst_79 : f32 to vector<1x32xf32>
    %433 = arith.addf %432, %431 : vector<1x32xf32>
    %434 = arith.divf %432, %433 : vector<1x32xf32>
    %435 = vector.extract_strided_slice %428 {offsets = [0, 32], sizes = [1, 32], strides = [1, 1]} : vector<1x128xf32> to vector<1x32xf32>
    %436 = arith.negf %435 : vector<1x32xf32>
    %437 = math.exp %436 : vector<1x32xf32>
    %cst_80 = arith.constant 1.000000e+00 : f32
    %438 = vector.broadcast %cst_80 : f32 to vector<1x32xf32>
    %439 = arith.addf %438, %437 : vector<1x32xf32>
    %440 = arith.divf %438, %439 : vector<1x32xf32>
    %441 = vector.extract_strided_slice %428 {offsets = [0, 64], sizes = [1, 32], strides = [1, 1]} : vector<1x128xf32> to vector<1x32xf32>
    %442 = math.tanh %441 : vector<1x32xf32>
    %443 = vector.extract_strided_slice %428 {offsets = [0, 96], sizes = [1, 32], strides = [1, 1]} : vector<1x128xf32> to vector<1x32xf32>
    %444 = arith.negf %443 : vector<1x32xf32>
    %445 = math.exp %444 : vector<1x32xf32>
    %cst_81 = arith.constant 1.000000e+00 : f32
    %446 = vector.broadcast %cst_81 : f32 to vector<1x32xf32>
    %447 = arith.addf %446, %445 : vector<1x32xf32>
    %448 = arith.divf %446, %447 : vector<1x32xf32>
    %449 = arith.mulf %440, %392 : vector<1x32xf32>
    %450 = arith.mulf %434, %442 : vector<1x32xf32>
    %451 = arith.addf %449, %450 : vector<1x32xf32>
    %452 = math.tanh %451 : vector<1x32xf32>
    %453 = arith.mulf %448, %452 : vector<1x32xf32>
    %c6 = arith.constant 6 : index
    %c0_82 = arith.constant 0 : index
    %454 = vector.load %arg9[%c6, %c0_82] : memref<8x32xf32, #tpu.memory_space<vmem>>, vector<1x32xf32>
    tpu.vector_store %arg9[%c6, %c0_82], %453 {strides = array<i32>} : memref<8x32xf32, #tpu.memory_space<vmem>>, vector<1x32xf32>,
    %455 = tpu.concatenate %424, %453 in 1 : vector<1x32xf32>, vector<1x32xf32> -> vector<1x64xf32>
    %456 = arith.truncf %455 : vector<1x64xf32> to vector<1x64xbf16>
    %cst_83 = arith.constant dense<0.000000e+00> : vector<1x128xf32>
    %457 = tpu.matmul %456, %1, %cst_83 {dimension_numbers = #tpu.dot_dimension_numbers<[1], [0], [0], [1], [0, 0, 1, 1], [], []>} : vector<1x64xbf16>, vector<64x128xbf16>, vector<1x128xf32> -> vector<1x128xf32>
    %458 = arith.addf %2, %457 : vector<1x128xf32>
    %459 = vector.extract_strided_slice %458 {offsets = [0, 0], sizes = [1, 32], strides = [1, 1]} : vector<1x128xf32> to vector<1x32xf32>
    %460 = arith.negf %459 : vector<1x32xf32>
    %461 = math.exp %460 : vector<1x32xf32>
    %cst_84 = arith.constant 1.000000e+00 : f32
    %462 = vector.broadcast %cst_84 : f32 to vector<1x32xf32>
    %463 = arith.addf %462, %461 : vector<1x32xf32>
    %464 = arith.divf %462, %463 : vector<1x32xf32>
    %465 = vector.extract_strided_slice %458 {offsets = [0, 32], sizes = [1, 32], strides = [1, 1]} : vector<1x128xf32> to vector<1x32xf32>
    %466 = arith.negf %465 : vector<1x32xf32>
    %467 = math.exp %466 : vector<1x32xf32>
    %cst_85 = arith.constant 1.000000e+00 : f32
    %468 = vector.broadcast %cst_85 : f32 to vector<1x32xf32>
    %469 = arith.addf %468, %467 : vector<1x32xf32>
    %470 = arith.divf %468, %469 : vector<1x32xf32>
    %471 = vector.extract_strided_slice %458 {offsets = [0, 64], sizes = [1, 32], strides = [1, 1]} : vector<1x128xf32> to vector<1x32xf32>
    %472 = math.tanh %471 : vector<1x32xf32>
    %473 = vector.extract_strided_slice %458 {offsets = [0, 96], sizes = [1, 32], strides = [1, 1]} : vector<1x128xf32> to vector<1x32xf32>
    %474 = arith.negf %473 : vector<1x32xf32>
    %475 = math.exp %474 : vector<1x32xf32>
    %cst_86 = arith.constant 1.000000e+00 : f32
    %476 = vector.broadcast %cst_86 : f32 to vector<1x32xf32>
    %477 = arith.addf %476, %475 : vector<1x32xf32>
    %478 = arith.divf %476, %477 : vector<1x32xf32>
    %479 = arith.mulf %470, %451 : vector<1x32xf32>
    %480 = arith.mulf %464, %472 : vector<1x32xf32>
    %481 = arith.addf %479, %480 : vector<1x32xf32>
    %482 = math.tanh %481 : vector<1x32xf32>
    %483 = arith.mulf %478, %482 : vector<1x32xf32>
    %c7 = arith.constant 7 : index
    %c0_87 = arith.constant 0 : index
    %484 = vector.load %arg9[%c7, %c0_87] : memref<8x32xf32, #tpu.memory_space<vmem>>, vector<1x32xf32>
    tpu.vector_store %arg9[%c7, %c0_87], %483 {strides = array<i32>} : memref<8x32xf32, #tpu.memory_space<vmem>>, vector<1x32xf32>,
    %c0_88 = arith.constant 0 : index
    %c0_89 = arith.constant 0 : index
    %485 = vector.load %arg9[%c0_88, %c0_89] : memref<8x32xf32, #tpu.memory_space<vmem>>, vector<8x32xf32>
    %486 = arith.truncf %485 : vector<8x32xf32> to vector<8x32xbf16>
    %c0_90 = arith.constant 0 : index
    %c0_91 = arith.constant 0 : index
    %487 = vector.load %arg6[%c0_90, %c0_91] : memref<32x128xbf16, #tpu.memory_space<vmem>>, vector<32x128xbf16>
    %cst_92 = arith.constant dense<0.000000e+00> : vector<8x128xf32>
    %488 = tpu.matmul %486, %487, %cst_92 {dimension_numbers = #tpu.dot_dimension_numbers<[1], [0], [0], [1], [0, 0, 1, 1], [], []>} : vector<8x32xbf16>, vector<32x128xbf16>, vector<8x128xf32> -> vector<8x128xf32>
    %c0_93 = arith.constant 0 : index
    %c0_94 = arith.constant 0 : index
    %489 = vector.load %arg7[%c0_93, %c0_94] : memref<1x128xf32, #tpu.memory_space<vmem>>, vector<1x128xf32>
    %490 = vector.broadcast %489 : vector<1x128xf32> to vector<8x128xf32>
    %491 = arith.addf %488, %490 : vector<8x128xf32>
    %cst_95 = arith.constant 0.000000e+00 : f32
    %492 = vector.broadcast %cst_95 : f32 to vector<8x128xf32>
    %493 = arith.maximumf %491, %492 : vector<8x128xf32>
    %494 = tpu.iota {dimensions = array<i32: 1>} : vector<8x128xi32>
    %c64_i32 = arith.constant 64 : i32
    %495 = vector.broadcast %c64_i32 : i32 to vector<8x128xi32>
    %496 = arith.cmpi slt, %494, %495 : vector<8x128xi32>
    %cst_96 = arith.constant -1.000000e+30 : f32
    %497 = vector.broadcast %cst_96 : f32 to vector<8x128xf32>
    %498 = arith.select %496, %493, %497 : vector<8x128xi1>, vector<8x128xf32>
    %cst_97 = arith.constant dense<0xFF800000> : vector<8xf32>
    %499 = vector.multi_reduction <maximumf>, %498, %cst_97 [1] : vector<8x128xf32> to vector<8xf32>
    %500 = vector.shape_cast %499 : vector<8xf32> to vector<8x1xf32>
    %501 = vector.broadcast %500 : vector<8x1xf32> to vector<8x128xf32>
    %502 = arith.subf %498, %501 : vector<8x128xf32>
    %503 = math.exp %502 : vector<8x128xf32>
    %cst_98 = arith.constant dense<0.000000e+00> : vector<8xf32>
    %504 = vector.multi_reduction <add>, %503, %cst_98 [1] : vector<8x128xf32> to vector<8xf32>
    %505 = vector.shape_cast %504 : vector<8xf32> to vector<8x1xf32>
    %506 = math.log %505 : vector<8x1xf32>
    %507 = vector.broadcast %506 : vector<8x1xf32> to vector<8x128xf32>
    %508 = arith.subf %502, %507 : vector<8x128xf32>
    %c0_99 = arith.constant 0 : index
    %c0_100 = arith.constant 0 : index
    %509 = vector.load %arg8[%c0_99, %c0_100] : memref<8x128xf32, #tpu.memory_space<vmem>>, vector<8x128xf32>
    tpu.vector_store %arg8[%c0_99, %c0_100], %508 {strides = array<i32>} : memref<8x128xf32, #tpu.memory_space<vmem>>, vector<8x128xf32>,
    return
  }
}

</mosaic_0001>

<bundles_post_ra>
// kernel: rnn_model_forward.1
= control target key start
LH: loop header
LB: loop body
LE: loop exit
PB: predicated region body
PF: predicated region fallthrough
CT: control target
= control target key end

     0   :  { %v2043_v1 = vmov 0.0   ;;  %vm2044_vm0 = vmmov 0   ;;  %vm68_vm1 = vcmask 261120   ;;  %s2517_s0 = inlined_call_operand.vmem [shape: bf16[8,32], index: 0, kind: input, shape index: {}]   ;;  %s2518_s1 = inlined_call_operand.vmem [shape: bf16[32,128], index: 1, kind: input, shape index: {}]   ;;  %s2519_s2 = inlined_call_operand.vmem [shape: bf16[32,128], index: 2, kind: input, shape index: {}]   ;;  %s2520_s3 = inlined_call_operand.vmem [shape: f32[1,128], index: 3, kind: input, shape index: {}]   ;;  %s2521_s4 = inlined_call_operand.vmem [shape: bf16[64,128], index: 4, kind: input, shape index: {}]   ;;  %s2522_s5 = inlined_call_operand.vmem [shape: f32[1,128], index: 5, kind: input, shape index: {}]   ;;  %s2523_s6 = inlined_call_operand.vmem [shape: bf16[32,128], index: 6, kind: input, shape index: {}]   ;;  %s2524_s7 = inlined_call_operand.vmem [shape: f32[1,128], index: 7, kind: input, shape index: {}]   ;;  %s2525_s8 = inlined_call_operand.hbm [shape: f32[8,128], index: 8, kind: output, shape index: {}]  }
   0x1   :  { %v1876_v0 = vld [vmem:[%s2518_s1] sm:$0xff]   ;;  %1694 = vmatprep.subr.bf16.mxu0 %v2043_v1  ;;  %1702 = vmatprep.subr.bf16.mxu1 %v2043_v1  ;;  %v1878_v3 = vld [vmem:[%s2518_s1 + $0x8] sm:$0xff]  }
   0x2   :  { %v2102_v2 = vld [vmem:[%s2519_s2] sm:$0xff]   ;;  %1695 = vmatpush3.bf16.msra.mxu0 %v1876_v0  ;;  %1698 = vmatprep.mubr.msk.bf16.mxu0 %vm2044_vm0, %v2043_v1  ;;  %v2114_v4 = vld [vmem:[%s2519_s2 + $0x8] sm:$0xff]  }
   0x3   :  { %1703 = vmatpush3.bf16.msra.mxu1 %v2102_v2  ;;  %1696 = vmatprep.subr.bf16.mxu0 %v2043_v1  ;;  %v44_v5 = vld [vmem:[%s2517_s0] sm:$0xf] }
   0x4   :  { %1704 = vmatprep.subr.bf16.mxu1 %v2043_v1  ;;  %1706 = vmatprep.mubr.msk.bf16.mxu1 %vm2044_vm0, %v2043_v1 }
   0x6   :  { %1697 = vmatpush3.bf16.msra.mxu0 %v1878_v3 }
   0x7   :  { %1705 = vmatpush3.bf16.msra.mxu1 %v2114_v4  ;;  %1710 = vmatprep.subr.bf16.mxu0 %v2043_v1 }
   0x8   :  { %1718 = vmatprep.subr.bf16.mxu1 %v2043_v1 }
   0x9   :  { %13 = vsyncpa [#allocation4], 0  ;;  %1699 = vmatmul.mubr.msk.bf16.vlgmr.msra.gmra.mrb[0].mxu0 %vm68_vm1, %v44_v5  ;;  %v2045_v6 = vmov 0   ;;  %v1579_v7 = vld [vmem:[%s2520_s3] ss:$0 sm:$0xff]  ;;  %s2046_s14 = smov 64  }
   0xa   :  { %1707 = vmatmul.mubr.bf16.vlgmr.msra.gmra.mrb[0].mxu1 %v2045_v6  ;;  %1711 = vmatpush3.bf16.msra.mxu0 %v2102_v2  ;;  %s2047_s3 = smov 32   ;;  %v2148_v28 = vld [vmem:[%s2521_s4] sm:$0xff]   ;;  %v2154_v29 = vld [vmem:[%s2521_s4 + $0x8] sm:$0xff]   ;;  %v2161_v30 = vld [vmem:[%s2521_s4 + $0x10] sm:$0xff]   ;;  %vm300_vm2 = vcmask 523264   ;;  %vm377_vm3 = vcmask 253952  }
   0xb   :  { %1712 = vmatprep.subr.bf16.mxu0 %v2043_v1  ;;  %1714 = vmatprep.mubr.msk.bf16.mxu0 %vm2044_vm0, %v2043_v1  ;;  %v2170_v32 = vld [vmem:[%s2521_s4 + $0x18] sm:$0xff]   ;;  %v2194_v40 = vld [vmem:[%s2522_s5] sm:$0x1] }
   0xc   :  { %1726 = vmatprep.mubr.msk.bf16.mxu1 %vm2044_vm0, %v2043_v1  ;;  %1719 = vmatpush3.bf16.msra.mxu1 %v2148_v28 }
   0xd   :  { %1720 = vmatprep.subr.bf16.mxu1 %v2043_v1 }
   0xe   :  { %1713 = vmatpush3.bf16.msra.mxu0 %v2114_v4 }
   0xf   :  { %1730 = vmatprep.subr.bf16.mxu0 %v2043_v1 }
  0x10   :  { %1721 = vmatpush3.bf16.msra.mxu1 %v2154_v29 }
  0x11   :  { %1722 = vmatprep.subr.bf16.mxu1 %v2043_v1 }
  0x14   :  { %1723 = vmatpush3.bf16.msra.mxu1 %v2161_v30 }
  0x15   :  { %1724 = vmatprep.subr.bf16.mxu1 %v2043_v1 }
  0x18   :  { %1725 = vmatpush3.bf16.msra.mxu1 %v2170_v32 }
  0x19   :  { %1750 = vmatprep.subr.bf16.mxu1 %v2043_v1 }
  0xdc   :  { %v106_v8 = vpop.f32.mrb[0].mxu0 }
  0xdd   :  { %v2137_v9 = vadd.f32 %v1579_v7, %v106_v8  ;;  %v161_v10 = vpop.f32.mrb[0].mxu1  ;;  %v1700_v11 = vpop.f32.mrb[1].mxu0 }
  0xde   :  { %v1708_v12 = vpop.f32.mrb[1].mxu1  ;;  %v109_v13 = vpop.f32.mrb[2].mxu0 }
  0xdf   :  { %v167_v14 = vadd.f32 %v161_v10, %v2137_v9  ;;  %v164_v15 = vpop.f32.mrb[2].mxu1  ;;  %v1701_v16 = vpop.f32.mrb[3].mxu0 }
  0xe0   :  { %v1709_v17 = vpop.f32.mrb[3].mxu1  ;;  %v370_v15 = vlaneseq }
  0xe1   :  { %1886 = vtanh.f32 %v167_v14  ;;  %v1585_v19 = vmul.f32 -1.442695, %v167_v14 }
  0xe2   :  { %v371_v17 = vshrl.u32 %v370_v15, 7 }
  0xe3   :  { %1888 = vpow2.f32 %v1585_v19 }
  0xeb   :  { %v1887_v18 = vpop.eup %1886 }
  0xec   :  { %177 = vrot.lane.b32.xlu0 %v1887_v18, %s2046_s14 }
  0xed   :  { %v1889_v20 = vpop.eup %1888 }
  0xee   :  { %v171_v21 = vadd.f32 1.0, %v1889_v20 }
  0xf0   :  { %1890 = vrcp.f32 %v171_v21  ;;  %v2213_v21 = vsub.s32 0, %v371_v17 }
  0xfa   :  { %v1891_v22 = vpop.eup %1890 }
  0xfb   :  { %v175_v25 = vmul.f32 0.0, %v1891_v22 }
 0x15e   :  { %v178_v23 = vpop.permute.xlu0 %177 }
 0x15f   :  { %v180_v24 = vmul.f32 %v1891_v22, %v178_v23 }
 0x161   :  { %182 = vrot.lane.b32.xlu0 %v180_v24, %s2047_s3 }
 0x1d3   :  { %v183_v26 = vpop.permute.xlu0 %182 }
 0x1d4   :  { %v2142_v27 = vadd.f32 %v183_v26, %v175_v25 }
 0x1d6   :  { %1892 = vtanh.f32 %v2142_v27  ;;  %v251_v5 = vrot.slane %v2142_v27, 7 }
 0x1e0   :  { %v1893_v31 = vpop.eup %1892 }
 0x1e1   :  { %188 = vrot.lane.b32.xlu1 %v1893_v31, %s2046_s14 }
 0x253   :  { %v189_v33 = vpop.permute.xlu1 %188 }
 0x254   :  { %v191_v34 = vmul.f32 %v1891_v22, %v189_v33 }
 0x256   :  { %v192_v35 = vpack.c.bf16 %v191_v34, %v191_v34  ;;  %271 = vrot.lane.b32.xlu0 %v191_v34, %s2047_s3 }
 0x258   :  { %194 = vrot.lane.b32.xlu1 %v192_v35, %s2047_s3 }
 0x2c8   :  { %v272_v36 = vpop.permute.xlu0 %271 }
 0x2c9   :  { %v274_v37 = vsel %vm68_vm1, %v272_v36, 0.0 }
 0x2ca   :  { %v275_v38 = vpack.c.bf16 %v274_v37, %v274_v37  ;;  %v195_v39 = vpop.permute.xlu1 %194 }
 0x2cb   :  { %1715 = vmatmul.mubr.msk.bf16.vlgmr.msra.gmra.mrb[4].mxu0 %vm68_vm1, %v195_v39 }
 0x2cc   :  { %1727 = vmatmul.mubr.msk.bf16.vlgmr.msra.gmra.mrb[4].mxu1 %vm300_vm2, %v275_v38  ;;  %1731 = vmatpush3.bf16.msra.mxu0 %v2102_v2 }
 0x2cd   :  { %1732 = vmatprep.subr.bf16.mxu0 %v2043_v1  ;;  %1734 = vmatprep.mubr.msk.bf16.mxu0 %vm2044_vm0, %v2043_v1 }
 0x2ce   :  { %1751 = vmatpush3.bf16.msra.mxu1 %v2102_v2  ;;  %1754 = vmatprep.mubr.msk.bf16.mxu1 %vm2044_vm0, %v2043_v1 }
 0x2cf   :  { %1752 = vmatprep.subr.bf16.mxu1 %v2043_v1 }
 0x2d0   :  { %1733 = vmatpush3.bf16.msra.mxu0 %v2114_v4 }
 0x2d1   :  { %1738 = vmatprep.subr.bf16.mxu0 %v2043_v1 }
 0x2d2   :  { %1753 = vmatpush3.bf16.msra.mxu1 %v2114_v4 }
 0x2d3   :  { %1758 = vmatprep.subr.bf16.mxu1 %v2043_v1 }
 0x39e   :  { %v233_v41 = vpop.f32.mrb[4].mxu0 }
 0x39f   :  { %v240_v42 = vrot.slane %v233_v41, 7  ;;  %v1716_v43 = vpop.f32.mrb[5].mxu0  ;;  %v338_v44 = vpop.f32.mrb[4].mxu1 }
 0x3a0   :  { %v344_v45 = vadd.f32 %v338_v44, %v2194_v40  ;;  %v236_v46 = vpop.f32.mrb[6].mxu0  ;;  %v1728_v47 = vpop.f32.mrb[5].mxu1 }
 0x3a1   :  { %v242_v48 = vadd.f32 %v240_v42, %v2137_v9  ;;  %v1717_v49 = vpop.f32.mrb[7].mxu0  ;;  %v341_v50 = vpop.f32.mrb[6].mxu1 }
 0x3a2   :  { %1894 = vtanh.f32 %v344_v45  ;;  %v1729_v51 = vpop.f32.mrb[7].mxu1  ;;  %v1593_v54 = vmul.f32 -1.442695, %v344_v45 }
 0x3a3   :  { %1896 = vtanh.f32 %v242_v48  ;;  %v1587_v55 = vmul.f32 -1.442695, %v242_v48 }
 0x3a4   :  { %1898 = vpow2.f32 %v1593_v54 }
 0x3a5   :  { %1900 = vpow2.f32 %v1587_v55 }
 0x3ac   :  { %v1895_v52 = vpop.eup %1894 }
 0x3ad   :  { %v1897_v53 = vpop.eup %1896  ;;  %354 = vrot.lane.b32.xlu0 %v1895_v52, %s2046_s14 }
 0x3ae   :  { %255 = vrot.lane.b32.xlu1 %v1897_v53, %s2046_s14  ;;  %v1899_v56 = vpop.eup %1898 }
 0x3af   :  { %v1901_v57 = vpop.eup %1900  ;;  %v348_v58 = vadd.f32 1.0, %v1899_v56 }
 0x3b0   :  { %v246_v59 = vadd.f32 1.0, %v1901_v57 }
 0x3b1   :  { %1902 = vrcp.f32 %v348_v58 }
 0x3b2   :  { %1904 = vrcp.f32 %v246_v59 }
 0x3bb   :  { %v1903_v60 = vpop.eup %1902 }
 0x3bc   :  { %v1905_v62 = vpop.eup %1904  ;;  %v352_v6 = vmul.f32 0.0, %v1903_v60 }
 0x3bd   :  { %v253_v8 = vmul.f32 %v1905_v62, %v251_v5 }
 0x41f   :  { %v355_v61 = vpop.permute.xlu0 %354 }
 0x420   :  { %v357_v63 = vmul.f32 %v1903_v60, %v355_v61  ;;  %v256_v0 = vpop.permute.xlu1 %255 }
 0x421   :  { %v258_v3 = vmul.f32 %v1905_v62, %v256_v0 }
 0x422   :  { %359 = vrot.lane.b32.xlu0 %v357_v63, %s2047_s3 }
 0x423   :  { %260 = vrot.lane.b32.xlu1 %v258_v3, %s2047_s3 }
 0x494   :  { %v360_v7 = vpop.permute.xlu0 %359 }
 0x495   :  { %v2203_v10 = vadd.f32 %v360_v7, %v352_v6  ;;  %v261_v11 = vpop.permute.xlu1 %260 }
 0x496   :  { %v2205_v12 = vadd.f32 %v261_v11, %v253_v8 }
 0x497   :  { %1906 = vtanh.f32 %v2203_v10 }
 0x498   :  { %1908 = vtanh.f32 %v2205_v12  ;;  %v440_v61 = vrot.slane %v2205_v12, 7 }
 0x4a1   :  { %v1907_v13 = vpop.eup %1906 }
 0x4a2   :  { %v1909_v14 = vpop.eup %1908  ;;  %365 = vrot.lane.b32.xlu0 %v1907_v13, %s2046_s14 }
 0x4a3   :  { %266 = vrot.lane.b32.xlu1 %v1909_v14, %s2046_s14 }
 0x514   :  { %v366_v19 = vpop.permute.xlu0 %365 }
 0x515   :  { %v267_v16 = vpop.permute.xlu1 %266  ;;  %v368_v22 = vmul.f32 %v1903_v60, %v366_v19 }
 0x516   :  { %v269_v18 = vmul.f32 %v1905_v62, %v267_v16 }
 0x517   :  { %v2217_v24 = vrot.slane %v368_v22, %v2213_v21 }
 0x518   :  { %v379_v20 = vpack.c.bf16 %v269_v18, %v269_v18  ;;  %460 = vrot.lane.b32.xlu0 %v269_v18, %s2047_s3 }
 0x51a   :  { %v381_v23 = vshrl.u32 %v379_v20, 16 }
 0x51c   :  { %383 = vrot.lane.b32.xlu1 %v381_v23, %s2047_s3 }
 0x520   :  { %463 = vrot.lane.b32.xlu1 %v2217_v24, %s2046_s14 }
 0x58a   :  { %v461_v27 = vpop.permute.xlu0 %460 }
 0x58e   :  { %v384_v25 = vpop.permute.xlu1 %383 }
 0x58f   :  { %1735 = vmatmul.mubr.msk.bf16.vlgmr.msra.gmra.mrb[8].mxu0 %vm68_vm1, %v384_v25 }
 0x590   :  { %1739 = vmatpush3.bf16.msra.mxu0 %v2148_v28  ;;  %1746 = vmatprep.mubr.msk.bf16.mxu0 %vm2044_vm0, %v2043_v1 }
 0x591   :  { %1740 = vmatprep.subr.bf16.mxu0 %v2043_v1 }
 0x592   :  { %v464_v26 = vpop.permute.xlu1 %463 }
 0x593   :  { %v466_v31 = vsel %vm68_vm1, %v461_v27, %v464_v26 }
 0x594   :  { %1741 = vmatpush3.bf16.msra.mxu0 %v2154_v29  ;;  %v467_v33 = vpack.c.bf16 %v466_v31, %v466_v31 }
 0x595   :  { %1742 = vmatprep.subr.bf16.mxu0 %v2043_v1 }
 0x596   :  { %v469_v34 = vshrl.u32 %v467_v33, 16 }
 0x598   :  { %1743 = vmatpush3.bf16.msra.mxu0 %v2161_v30 }
 0x599   :  { %1744 = vmatprep.subr.bf16.mxu0 %v2043_v1 }
 0x59c   :  { %1745 = vmatpush3.bf16.msra.mxu0 %v2170_v32 }
 0x59d   :  { %1770 = vmatprep.subr.bf16.mxu0 %v2043_v1 }
 0x59f   :  { %1747 = vmatmul.mubr.msk.bf16.vlgmr.msra.gmra.mrb[12].mxu0 %vm300_vm2, %v469_v34 }
 0x5a0   :  { %1771 = vmatpush3.bf16.msra.mxu0 %v2102_v2  ;;  %1774 = vmatprep.mubr.msk.bf16.mxu0 %vm2044_vm0, %v2043_v1 }
 0x5a1   :  { %1772 = vmatprep.subr.bf16.mxu0 %v2043_v1 }
 0x5a4   :  { %1773 = vmatpush3.bf16.msra.mxu0 %v2114_v4 }
 0x5a5   :  { %1778 = vmatprep.subr.bf16.mxu0 %v2043_v1 }
 0x662   :  { %v422_v35 = vpop.f32.mrb[8].mxu0 }
 0x663   :  { %v429_v36 = vrot.slane %v422_v35, 6  ;;  %v1736_v37 = vpop.f32.mrb[9].mxu0 }
 0x664   :  { %v425_v38 = vpop.f32.mrb[10].mxu0 }
 0x665   :  { %v431_v39 = vadd.f32 %v429_v36, %v2137_v9  ;;  %v1737_v41 = vpop.f32.mrb[11].mxu0 }
 0x667   :  { %1910 = vtanh.f32 %v431_v39  ;;  %v1595_v49 = vmul.f32 -1.442695, %v431_v39 }
 0x671   :  { %v1911_v42 = vpop.eup %1910 }
 0x672   :  { %v508_v43 = vpop.f32.mrb[12].mxu0  ;;  %444 = vrot.lane.b32.xlu0 %v1911_v42, %s2046_s14 }
 0x673   :  { %v514_v44 = vadd.f32 %v508_v43, %v2194_v40  ;;  %v1748_v45 = vpop.f32.mrb[13].mxu0 }
 0x674   :  { %v511_v46 = vpop.f32.mrb[14].mxu0 }
 0x675   :  { %1912 = vtanh.f32 %v514_v44  ;;  %v1749_v47 = vpop.f32.mrb[15].mxu0  ;;  %v1597_v51 = vmul.f32 -1.442695, %v514_v44 }
 0x676   :  { %1914 = vpow2.f32 %v1595_v49 }
 0x677   :  { %1916 = vpow2.f32 %v1597_v51 }
 0x67f   :  { %v1913_v48 = vpop.eup %1912 }
 0x680   :  { %524 = vrot.lane.b32.xlu1 %v1913_v48, %s2046_s14  ;;  %v1915_v50 = vpop.eup %1914 }
 0x681   :  { %v435_v52 = vadd.f32 1.0, %v1915_v50  ;;  %v1917_v53 = vpop.eup %1916 }
 0x682   :  { %v518_v55 = vadd.f32 1.0, %v1917_v53 }
 0x683   :  { %1918 = vrcp.f32 %v435_v52 }
 0x684   :  { %1920 = vrcp.f32 %v518_v55 }
 0x68d   :  { %v1919_v54 = vpop.eup %1918 }
 0x68e   :  { %v1921_v58 = vpop.eup %1920  ;;  %v442_v62 = vmul.f32 %v1919_v54, %v440_v61 }
 0x68f   :  { %v522_v5 = vmul.f32 %v1921_v58, %v2203_v10 }
 0x6e4   :  { %v445_v56 = vpop.permute.xlu0 %444 }
 0x6e5   :  { %v447_v57 = vmul.f32 %v1919_v54, %v445_v56 }
 0x6e7   :  { %449 = vrot.lane.b32.xlu0 %v447_v57, %s2047_s3 }
 0x6f2   :  { %v525_v59 = vpop.permute.xlu1 %524 }
 0x6f3   :  { %v527_v60 = vmul.f32 %v1921_v58, %v525_v59 }
 0x6f5   :  { %529 = vrot.lane.b32.xlu1 %v527_v60, %s2047_s3 }
 0x759   :  { %v450_v63 = vpop.permute.xlu0 %449 }
 0x75a   :  { %v2247_v0 = vadd.f32 %v450_v63, %v442_v62 }
 0x75c   :  { %1922 = vtanh.f32 %v2247_v0  ;;  %v608_v56 = vrot.slane %v2247_v0, 7 }
 0x766   :  { %v1923_v3 = vpop.eup %1922 }
 0x767   :  { %v530_v6 = vpop.permute.xlu1 %529  ;;  %455 = vrot.lane.b32.xlu0 %v1923_v3, %s2046_s14 }
 0x768   :  { %v2252_v7 = vadd.f32 %v530_v6, %v522_v5 }
 0x76a   :  { %1924 = vtanh.f32 %v2252_v7 }
 0x774   :  { %v1925_v8 = vpop.eup %1924 }
 0x775   :  { %535 = vrot.lane.b32.xlu1 %v1925_v8, %s2046_s14 }
 0x7d9   :  { %v456_v11 = vpop.permute.xlu0 %455 }
 0x7da   :  { %v458_v12 = vmul.f32 %v1919_v54, %v456_v11 }
 0x7dc   :  { %v548_v13 = vpack.c.bf16 %v458_v12, %v458_v12  ;;  %628 = vrot.lane.b32.xlu1 %v458_v12, %s2047_s3 }
 0x7de   :  { %v550_v14 = vrot.slane %v548_v13, 1 }
 0x7e0   :  { %551 = vrot.lane.b32.xlu0 %v550_v14, %s2047_s3 }
 0x7e7   :  { %v536_v16 = vpop.permute.xlu1 %535 }
 0x7e8   :  { %v538_v10 = vmul.f32 %v1921_v58, %v536_v16 }
 0x7ea   :  { %v2259_v17 = vrot.slane %v538_v10, %v2213_v21 }
 0x7ec   :  { %631 = vrot.lane.b32.xlu0 %v2259_v17, %s2046_s14 }
 0x84e   :  { %v629_v19 = vpop.permute.xlu1 %628 }
 0x852   :  { %v552_v18 = vpop.permute.xlu0 %551 }
 0x853   :  { %1755 = vmatmul.mubr.msk.bf16.vlgmr.msra.gmra.mrb[8].mxu1 %vm68_vm1, %v552_v18 }
 0x854   :  { %1759 = vmatpush3.bf16.msra.mxu1 %v2148_v28  ;;  %1766 = vmatprep.mubr.msk.bf16.mxu1 %vm2044_vm0, %v2043_v1 }
 0x855   :  { %1760 = vmatprep.subr.bf16.mxu1 %v2043_v1 }
 0x858   :  { %1761 = vmatpush3.bf16.msra.mxu1 %v2154_v29 }
 0x859   :  { %1762 = vmatprep.subr.bf16.mxu1 %v2043_v1 }
 0x85c   :  { %1763 = vmatpush3.bf16.msra.mxu1 %v2161_v30 }
 0x85d   :  { %1764 = vmatprep.subr.bf16.mxu1 %v2043_v1 }
 0x85e   :  { %v632_v20 = vpop.permute.xlu0 %631 }
 0x85f   :  { %v634_v22 = vsel %vm68_vm1, %v629_v19, %v632_v20 }
 0x860   :  { %v635_v23 = vpack.c.bf16 %v634_v22, %v634_v22  ;;  %1765 = vmatpush3.bf16.msra.mxu1 %v2170_v32 }
 0x861   :  { %1790 = vmatprep.subr.bf16.mxu1 %v2043_v1 }
 0x862   :  { %v637_v25 = vrot.slane %v635_v23, 1 }
 0x864   :  { %1767 = vmatmul.mubr.msk.bf16.vlgmr.msra.gmra.mrb[12].mxu1 %vm300_vm2, %v637_v25 }
 0x865   :  { %1791 = vmatpush3.bf16.msra.mxu1 %v2102_v2  ;;  %1794 = vmatprep.mubr.msk.bf16.mxu1 %vm2044_vm0, %v2043_v1 }
 0x866   :  { %1792 = vmatprep.subr.bf16.mxu1 %v2043_v1 }
 0x869   :  { %1793 = vmatpush3.bf16.msra.mxu1 %v2114_v4 }
 0x86a   :  { %1798 = vmatprep.subr.bf16.mxu1 %v2043_v1 }
 0x926   :  { %v590_v26 = vpop.f32.mrb[8].mxu1 }
 0x927   :  { %v597_v27 = vrot.slane %v590_v26, 5  ;;  %v1756_v31 = vpop.f32.mrb[9].mxu1 }
 0x928   :  { %v593_v33 = vpop.f32.mrb[10].mxu1 }
 0x929   :  { %v599_v34 = vadd.f32 %v597_v27, %v2137_v9  ;;  %v1757_v35 = vpop.f32.mrb[11].mxu1 }
 0x92b   :  { %1926 = vtanh.f32 %v599_v34  ;;  %v1599_v44 = vmul.f32 -1.442695, %v599_v34 }
 0x935   :  { %v1927_v36 = vpop.eup %1926 }
 0x936   :  { %612 = vrot.lane.b32.xlu1 %v1927_v36, %s2046_s14 }
 0x937   :  { %v675_v37 = vpop.f32.mrb[12].mxu1 }
 0x938   :  { %v681_v38 = vadd.f32 %v675_v37, %v2194_v40  ;;  %v1768_v39 = vpop.f32.mrb[13].mxu1 }
 0x939   :  { %v678_v41 = vpop.f32.mrb[14].mxu1 }
 0x93a   :  { %v1769_v42 = vpop.f32.mrb[15].mxu1  ;;  %1928 = vtanh.f32 %v681_v38  ;;  %v1601_v46 = vmul.f32 -1.442695, %v681_v38 }
 0x93b   :  { %1930 = vpow2.f32 %v1599_v44 }
 0x93c   :  { %1932 = vpow2.f32 %v1601_v46 }
 0x944   :  { %v1929_v43 = vpop.eup %1928 }
 0x945   :  { %691 = vrot.lane.b32.xlu0 %v1929_v43, %s2046_s14  ;;  %v1931_v45 = vpop.eup %1930 }
 0x946   :  { %v603_v47 = vadd.f32 1.0, %v1931_v45  ;;  %v1933_v48 = vpop.eup %1932 }
 0x947   :  { %v685_v52 = vadd.f32 1.0, %v1933_v48 }
 0x948   :  { %1934 = vrcp.f32 %v603_v47 }
 0x949   :  { %1936 = vrcp.f32 %v685_v52 }
 0x952   :  { %v1935_v49 = vpop.eup %1934 }
 0x953   :  { %v1937_v53 = vpop.eup %1936  ;;  %v610_v57 = vmul.f32 %v1935_v49, %v608_v56 }
 0x954   :  { %v689_v61 = vmul.f32 %v1937_v53, %v2252_v7 }
 0x9a8   :  { %v613_v50 = vpop.permute.xlu1 %612 }
 0x9a9   :  { %v615_v51 = vmul.f32 %v1935_v49, %v613_v50 }
 0x9ab   :  { %617 = vrot.lane.b32.xlu1 %v615_v51, %s2047_s3 }
 0x9b7   :  { %v692_v54 = vpop.permute.xlu0 %691 }
 0x9b8   :  { %v694_v55 = vmul.f32 %v1937_v53, %v692_v54 }
 0x9ba   :  { %696 = vrot.lane.b32.xlu0 %v694_v55, %s2047_s3 }
 0xa1d   :  { %v618_v58 = vpop.permute.xlu1 %617 }
 0xa1e   :  { %v2289_v59 = vadd.f32 %v618_v58, %v610_v57 }
 0xa20   :  { %1938 = vtanh.f32 %v2289_v59  ;;  %v777_v54 = vrot.slane %v2289_v59, 7 }
 0xa2a   :  { %v1939_v60 = vpop.eup %1938 }
 0xa2b   :  { %623 = vrot.lane.b32.xlu1 %v1939_v60, %s2046_s14 }
 0xa2c   :  { %v697_v62 = vpop.permute.xlu0 %696 }
 0xa2d   :  { %v2294_v63 = vadd.f32 %v697_v62, %v689_v61 }
 0xa2f   :  { %1940 = vtanh.f32 %v2294_v63 }
 0xa39   :  { %v1941_v3 = vpop.eup %1940 }
 0xa3a   :  { %702 = vrot.lane.b32.xlu0 %v1941_v3, %s2046_s14 }
 0xa9d   :  { %v624_v0 = vpop.permute.xlu1 %623 }
 0xa9e   :  { %v626_v5 = vmul.f32 %v1935_v49, %v624_v0 }
 0xaa0   :  { %v715_v6 = vpack.c.bf16 %v626_v5, %v626_v5  ;;  %797 = vrot.lane.b32.xlu0 %v626_v5, %s2047_s3 }
 0xaa2   :  { %v717_v8 = vshrl.u32 %v715_v6, 16 }
 0xaa4   :  { %v719_v11 = vrot.slane %v717_v8, 1 }
 0xaa6   :  { %720 = vrot.lane.b32.xlu1 %v719_v11, %s2047_s3 }
 0xaac   :  { %v703_v12 = vpop.permute.xlu0 %702 }
 0xaad   :  { %v705_v13 = vmul.f32 %v1937_v53, %v703_v12 }
 0xaaf   :  { %v2301_v7 = vrot.slane %v705_v13, %v2213_v21 }
 0xab1   :  { %800 = vrot.lane.b32.xlu1 %v2301_v7, %s2046_s14 }
 0xb12   :  { %v798_v16 = vpop.permute.xlu0 %797 }
 0xb18   :  { %v721_v14 = vpop.permute.xlu1 %720 }
 0xb19   :  { %1775 = vmatmul.mubr.msk.bf16.vlgmr.msra.gmra.mrb[16].mxu0 %vm68_vm1, %v721_v14 }
 0xb1a   :  { %1779 = vmatpush3.bf16.msra.mxu0 %v2148_v28  ;;  %1786 = vmatprep.mubr.msk.bf16.mxu0 %vm2044_vm0, %v2043_v1 }
 0xb1b   :  { %1780 = vmatprep.subr.bf16.mxu0 %v2043_v1 }
 0xb1e   :  { %1781 = vmatpush3.bf16.msra.mxu0 %v2154_v29 }
 0xb1f   :  { %1782 = vmatprep.subr.bf16.mxu0 %v2043_v1 }
 0xb22   :  { %1783 = vmatpush3.bf16.msra.mxu0 %v2161_v30 }
 0xb23   :  { %1784 = vmatprep.subr.bf16.mxu0 %v2043_v1  ;;  %v801_v10 = vpop.permute.xlu1 %800 }
 0xb24   :  { %v803_v18 = vsel %vm68_vm1, %v798_v16, %v801_v10 }
 0xb25   :  { %v804_v19 = vpack.c.bf16 %v803_v18, %v803_v18 }
 0xb26   :  { %1785 = vmatpush3.bf16.msra.mxu0 %v2170_v32 }
 0xb27   :  { %1810 = vmatprep.subr.bf16.mxu0 %v2043_v1  ;;  %v806_v20 = vshrl.u32 %v804_v19, 16 }
 0xb29   :  { %v808_v22 = vrot.slane %v806_v20, 1 }
 0xb2b   :  { %1787 = vmatmul.mubr.msk.bf16.vlgmr.msra.gmra.mrb[20].mxu0 %vm300_vm2, %v808_v22 }
 0xb2c   :  { %1811 = vmatpush3.bf16.msra.mxu0 %v2102_v2  ;;  %1814 = vmatprep.mubr.msk.bf16.mxu0 %vm2044_vm0, %v2043_v1 }
 0xb2d   :  { %1812 = vmatprep.subr.bf16.mxu0 %v2043_v1 }
 0xb30   :  { %1813 = vmatpush3.bf16.msra.mxu0 %v2114_v4 }
 0xb31   :  { %1818 = vmatprep.subr.bf16.mxu0 %v2043_v1 }
 0xbec   :  { %v759_v23 = vpop.f32.mrb[16].mxu0 }
 0xbed   :  { %v766_v25 = vrot.slane %v759_v23, 4  ;;  %v1776_v26 = vpop.f32.mrb[17].mxu0 }
 0xbee   :  { %v762_v27 = vpop.f32.mrb[18].mxu0 }
 0xbef   :  { %v768_v31 = vadd.f32 %v766_v25, %v2137_v9  ;;  %v1777_v33 = vpop.f32.mrb[19].mxu0 }
 0xbf1   :  { %1942 = vtanh.f32 %v768_v31  ;;  %v1603_v42 = vmul.f32 -1.442695, %v768_v31 }
 0xbfb   :  { %v1943_v34 = vpop.eup %1942 }
 0xbfc   :  { %781 = vrot.lane.b32.xlu0 %v1943_v34, %s2046_s14 }
 0xbfe   :  { %v846_v35 = vpop.f32.mrb[20].mxu0 }
 0xbff   :  { %v852_v36 = vadd.f32 %v846_v35, %v2194_v40  ;;  %v1788_v37 = vpop.f32.mrb[21].mxu0 }
 0xc00   :  { %v849_v38 = vpop.f32.mrb[22].mxu0 }
 0xc01   :  { %1944 = vtanh.f32 %v852_v36  ;;  %v1789_v39 = vpop.f32.mrb[23].mxu0  ;;  %v1605_v45 = vmul.f32 -1.442695, %v852_v36 }
 0xc02   :  { %1946 = vpow2.f32 %v1603_v42 }
 0xc0b   :  { %v1945_v41 = vpop.eup %1944 }
 0xc0c   :  { %862 = vrot.lane.b32.xlu1 %v1945_v41, %s2046_s14  ;;  %v1947_v43 = vpop.eup %1946 }
 0xc0d   :  { %v772_v44 = vadd.f32 1.0, %v1947_v43 }
 0xc0f   :  { %1948 = vrcp.f32 %v772_v44 }
 0xc10   :  { %1950 = vpow2.f32 %v1605_v45 }
 0xc19   :  { %v1949_v46 = vpop.eup %1948 }
 0xc1a   :  { %v1951_v47 = vpop.eup %1950  ;;  %v779_v55 = vmul.f32 %v1949_v46, %v777_v54 }
 0xc1b   :  { %v856_v50 = vadd.f32 1.0, %v1951_v47 }
 0xc1d   :  { %1952 = vrcp.f32 %v856_v50 }
 0xc27   :  { %v1953_v51 = vpop.eup %1952 }
 0xc28   :  { %v860_v60 = vmul.f32 %v1953_v51, %v2294_v63 }
 0xc6e   :  { %v782_v48 = vpop.permute.xlu0 %781 }
 0xc6f   :  { %v784_v49 = vmul.f32 %v1949_v46, %v782_v48 }
 0xc71   :  { %786 = vrot.lane.b32.xlu0 %v784_v49, %s2047_s3 }
 0xc7e   :  { %v863_v52 = vpop.permute.xlu1 %862 }
 0xc7f   :  { %v865_v53 = vmul.f32 %v1953_v51, %v863_v52 }
 0xc81   :  { %867 = vrot.lane.b32.xlu1 %v865_v53, %s2047_s3 }
 0xce3   :  { %v787_v56 = vpop.permute.xlu0 %786 }
 0xce4   :  { %v2331_v57 = vadd.f32 %v787_v56, %v779_v55 }
 0xce6   :  { %1954 = vtanh.f32 %v2331_v57  ;;  %v946_v49 = vrot.slane %v2331_v57, 7 }
 0xcf0   :  { %v1955_v58 = vpop.eup %1954 }
 0xcf1   :  { %792 = vrot.lane.b32.xlu0 %v1955_v58, %s2046_s14 }
 0xcf3   :  { %v868_v61 = vpop.permute.xlu1 %867 }
 0xcf4   :  { %v2336_v62 = vadd.f32 %v868_v61, %v860_v60 }
 0xcf6   :  { %1956 = vtanh.f32 %v2336_v62 }
 0xd00   :  { %v1957_v3 = vpop.eup %1956 }
 0xd01   :  { %873 = vrot.lane.b32.xlu1 %v1957_v3, %s2046_s14 }
 0xd63   :  { %v793_v59 = vpop.permute.xlu0 %792 }
 0xd64   :  { %v795_v0 = vmul.f32 %v1949_v46, %v793_v59 }
 0xd66   :  { %v886_v5 = vpack.c.bf16 %v795_v0, %v795_v0  ;;  %966 = vrot.lane.b32.xlu1 %v795_v0, %s2047_s3 }
 0xd68   :  { %v888_v6 = vrot.slane %v886_v5, 2 }
 0xd6a   :  { %889 = vrot.lane.b32.xlu0 %v888_v6, %s2047_s3 }
 0xd73   :  { %v874_v8 = vpop.permute.xlu1 %873 }
 0xd74   :  { %v876_v11 = vmul.f32 %v1953_v51, %v874_v8 }
 0xd76   :  { %v2343_v63 = vrot.slane %v876_v11, %v2213_v21 }
 0xd78   :  { %969 = vrot.lane.b32.xlu0 %v2343_v63, %s2046_s14 }
 0xdd8   :  { %v967_v13 = vpop.permute.xlu1 %966 }
 0xddc   :  { %v890_v12 = vpop.permute.xlu0 %889 }
 0xddd   :  { %1795 = vmatmul.mubr.msk.bf16.vlgmr.msra.gmra.mrb[16].mxu1 %vm68_vm1, %v890_v12 }
 0xdde   :  { %1799 = vmatpush3.bf16.msra.mxu1 %v2148_v28  ;;  %1806 = vmatprep.mubr.msk.bf16.mxu1 %vm2044_vm0, %v2043_v1 }
 0xddf   :  { %1800 = vmatprep.subr.bf16.mxu1 %v2043_v1 }
 0xde2   :  { %1801 = vmatpush3.bf16.msra.mxu1 %v2154_v29 }
 0xde3   :  { %1802 = vmatprep.subr.bf16.mxu1 %v2043_v1 }
 0xde6   :  { %1803 = vmatpush3.bf16.msra.mxu1 %v2161_v30 }
 0xde7   :  { %1804 = vmatprep.subr.bf16.mxu1 %v2043_v1 }
 0xdea   :  { %1805 = vmatpush3.bf16.msra.mxu1 %v2170_v32  ;;  %v970_v14 = vpop.permute.xlu0 %969 }
 0xdeb   :  { %1830 = vmatprep.subr.bf16.mxu1 %v2043_v1  ;;  %v972_v16 = vsel %vm68_vm1, %v967_v13, %v970_v14 }
 0xdec   :  { %v973_v10 = vpack.c.bf16 %v972_v16, %v972_v16 }
 0xdee   :  { %v975_v18 = vrot.slane %v973_v10, 2 }
 0xdf0   :  { %1807 = vmatmul.mubr.msk.bf16.vlgmr.msra.gmra.mrb[20].mxu1 %vm300_vm2, %v975_v18 }
 0xdf1   :  { %1831 = vmatpush3.bf16.msra.mxu1 %v2102_v2  ;;  %1834 = vmatprep.mubr.msk.bf16.mxu1 %vm2044_vm0, %v2043_v1 }
 0xdf2   :  { %1832 = vmatprep.subr.bf16.mxu1 %v2043_v1 }
 0xdf5   :  { %1833 = vmatpush3.bf16.msra.mxu1 %v2114_v4 }
 0xdf6   :  { %1838 = vmatprep.subr.bf16.mxu1 %v2043_v1 }
 0xeb0   :  { %v928_v19 = vpop.f32.mrb[16].mxu1 }
 0xeb1   :  { %v935_v20 = vrot.slane %v928_v19, 3  ;;  %v1796_v22 = vpop.f32.mrb[17].mxu1 }
 0xeb2   :  { %v931_v23 = vpop.f32.mrb[18].mxu1 }
 0xeb3   :  { %v937_v25 = vadd.f32 %v935_v20, %v2137_v9  ;;  %v1797_v26 = vpop.f32.mrb[19].mxu1 }
 0xeb5   :  { %1958 = vtanh.f32 %v937_v25  ;;  %v1607_v36 = vmul.f32 -1.442695, %v937_v25 }
 0xebf   :  { %v1959_v27 = vpop.eup %1958 }
 0xec0   :  { %950 = vrot.lane.b32.xlu1 %v1959_v27, %s2046_s14 }
 0xec3   :  { %v1013_v2 = vpop.f32.mrb[20].mxu1 }
 0xec4   :  { %v1019_v31 = vadd.f32 %v1013_v2, %v2194_v40  ;;  %v1808_v33 = vpop.f32.mrb[21].mxu1 }
 0xec5   :  { %v1016_v34 = vpop.f32.mrb[22].mxu1 }
 0xec6   :  { %1960 = vtanh.f32 %v1019_v31  ;;  %v1809_v4 = vpop.f32.mrb[23].mxu1  ;;  %v1609_v39 = vmul.f32 -1.442695, %v1019_v31 }
 0xec7   :  { %1962 = vpow2.f32 %v1607_v36 }
 0xed0   :  { %v1961_v35 = vpop.eup %1960 }
 0xed1   :  { %1029 = vrot.lane.b32.xlu0 %v1961_v35, %s2046_s14  ;;  %v1963_v37 = vpop.eup %1962 }
 0xed2   :  { %v941_v38 = vadd.f32 1.0, %v1963_v37 }
 0xed4   :  { %1964 = vrcp.f32 %v941_v38 }
 0xed5   :  { %1966 = vpow2.f32 %v1609_v39 }
 0xede   :  { %v1965_v41 = vpop.eup %1964 }
 0xedf   :  { %v1967_v43 = vpop.eup %1966  ;;  %v948_v50 = vmul.f32 %v1965_v41, %v946_v49 }
 0xee0   :  { %v1023_v45 = vadd.f32 1.0, %v1967_v43 }
 0xee2   :  { %1968 = vrcp.f32 %v1023_v45 }
 0xeec   :  { %v1969_v46 = vpop.eup %1968 }
 0xeed   :  { %v1027_v54 = vmul.f32 %v1969_v46, %v2336_v62 }
 0xf32   :  { %v951_v42 = vpop.permute.xlu1 %950 }
 0xf33   :  { %v953_v44 = vmul.f32 %v1965_v41, %v951_v42 }
 0xf35   :  { %955 = vrot.lane.b32.xlu1 %v953_v44, %s2047_s3 }
 0xf43   :  { %v1030_v47 = vpop.permute.xlu0 %1029 }
 0xf44   :  { %v1032_v48 = vmul.f32 %v1969_v46, %v1030_v47 }
 0xf46   :  { %1034 = vrot.lane.b32.xlu0 %v1032_v48, %s2047_s3 }
 0xfa7   :  { %v956_v51 = vpop.permute.xlu1 %955 }
 0xfa8   :  { %v2373_v52 = vadd.f32 %v956_v51, %v948_v50 }
 0xfaa   :  { %1970 = vtanh.f32 %v2373_v52  ;;  %v1115_v47 = vrot.slane %v2373_v52, 7 }
 0xfb4   :  { %v1971_v53 = vpop.eup %1970 }
 0xfb5   :  { %961 = vrot.lane.b32.xlu1 %v1971_v53, %s2046_s14 }
 0xfb8   :  { %v1035_v55 = vpop.permute.xlu0 %1034 }
 0xfb9   :  { %v2378_v56 = vadd.f32 %v1035_v55, %v1027_v54 }
 0xfbb   :  { %1972 = vtanh.f32 %v2378_v56 }
 0xfc5   :  { %v1973_v58 = vpop.eup %1972 }
 0xfc6   :  { %1040 = vrot.lane.b32.xlu0 %v1973_v58, %s2046_s14 }
0x1027   :  { %v962_v57 = vpop.permute.xlu1 %961 }
0x1028   :  { %v964_v60 = vmul.f32 %v1965_v41, %v962_v57 }
0x102a   :  { %v1053_v61 = vpack.c.bf16 %v964_v60, %v964_v60  ;;  %1135 = vrot.lane.b32.xlu0 %v964_v60, %s2047_s3 }
0x102c   :  { %v1055_v3 = vshrl.u32 %v1053_v61, 16 }
0x102e   :  { %v1057_v59 = vrot.slane %v1055_v3, 2 }
0x1030   :  { %1058 = vrot.lane.b32.xlu1 %v1057_v59, %s2047_s3 }
0x1038   :  { %v1041_v0 = vpop.permute.xlu0 %1040 }
0x1039   :  { %v1043_v5 = vmul.f32 %v1969_v46, %v1041_v0 }
0x103b   :  { %v2385_v62 = vrot.slane %v1043_v5, %v2213_v21 }
0x103d   :  { %1138 = vrot.lane.b32.xlu1 %v2385_v62, %s2046_s14 }
0x109c   :  { %v1136_v8 = vpop.permute.xlu0 %1135 }
0x10a2   :  { %v1059_v6 = vpop.permute.xlu1 %1058 }
0x10a3   :  { %1815 = vmatmul.mubr.msk.bf16.vlgmr.msra.gmra.mrb[24].mxu0 %vm68_vm1, %v1059_v6 }
0x10a4   :  { %1819 = vmatpush3.bf16.msra.mxu0 %v2148_v28  ;;  %1826 = vmatprep.mubr.msk.bf16.mxu0 %vm2044_vm0, %v2043_v1 }
0x10a5   :  { %1820 = vmatprep.subr.bf16.mxu0 %v2043_v1 }
0x10a8   :  { %1821 = vmatpush3.bf16.msra.mxu0 %v2154_v29 }
0x10a9   :  { %1822 = vmatprep.subr.bf16.mxu0 %v2043_v1 }
0x10ac   :  { %1823 = vmatpush3.bf16.msra.mxu0 %v2161_v30 }
0x10ad   :  { %1824 = vmatprep.subr.bf16.mxu0 %v2043_v1 }
0x10af   :  { %v1139_v11 = vpop.permute.xlu1 %1138 }
0x10b0   :  { %1825 = vmatpush3.bf16.msra.mxu0 %v2170_v32  ;;  %v1141_v12 = vsel %vm68_vm1, %v1136_v8, %v1139_v11 }
0x10b1   :  { %1850 = vmatprep.subr.bf16.mxu0 %v2043_v1  ;;  %v1142_v13 = vpack.c.bf16 %v1141_v12, %v1141_v12 }
0x10b3   :  { %v1144_v14 = vshrl.u32 %v1142_v13, 16 }
0x10b5   :  { %v1146_v16 = vrot.slane %v1144_v14, 2 }
0x10b7   :  { %1827 = vmatmul.mubr.msk.bf16.vlgmr.msra.gmra.mrb[28].mxu0 %vm300_vm2, %v1146_v16 }
0x10b8   :  { %1851 = vmatpush3.bf16.msra.mxu0 %v2148_v28  ;;  %1858 = vmatprep.mubr.msk.bf16.mxu0 %vm2044_vm0, %v2043_v1 }
0x10b9   :  { %1852 = vmatprep.subr.bf16.mxu0 %v2043_v1 }
0x10bc   :  { %1853 = vmatpush3.bf16.msra.mxu0 %v2154_v29 }
0x10bd   :  { %1854 = vmatprep.subr.bf16.mxu0 %v2043_v1 }
0x10c0   :  { %1855 = vmatpush3.bf16.msra.mxu0 %v2161_v30 }
0x10c1   :  { %1856 = vmatprep.subr.bf16.mxu0 %v2043_v1 }
0x10c4   :  { %1857 = vmatpush3.bf16.msra.mxu0 %v2170_v32 }
0x1176   :  { %v1097_v10 = vpop.f32.mrb[24].mxu0 }
0x1177   :  { %v1104_v18 = vrot.slane %v1097_v10, 2  ;;  %v1816_v19 = vpop.f32.mrb[25].mxu0 }
0x1178   :  { %v1100_v20 = vpop.f32.mrb[26].mxu0 }
0x1179   :  { %v1106_v22 = vadd.f32 %v1104_v18, %v2137_v9  ;;  %v1817_v23 = vpop.f32.mrb[27].mxu0 }
0x117b   :  { %1974 = vtanh.f32 %v1106_v22  ;;  %v1611_v4 = vmul.f32 -1.442695, %v1106_v22 }
0x1185   :  { %v1975_v25 = vpop.eup %1974 }
0x1186   :  { %1119 = vrot.lane.b32.xlu0 %v1975_v25, %s2046_s14 }
0x118a   :  { %v1184_v26 = vpop.f32.mrb[28].mxu0 }
0x118b   :  { %v1190_v27 = vadd.f32 %v1184_v26, %v2194_v40  ;;  %v1828_v2 = vpop.f32.mrb[29].mxu0 }
0x118c   :  { %v1187_v31 = vpop.f32.mrb[30].mxu0 }
0x118d   :  { %1976 = vtanh.f32 %v1190_v27  ;;  %v1829_v33 = vpop.f32.mrb[31].mxu0  ;;  %v1613_v37 = vmul.f32 -1.442695, %v1190_v27 }
0x118e   :  { %1978 = vpow2.f32 %v1611_v4 }
0x1197   :  { %v1977_v34 = vpop.eup %1976 }
0x1198   :  { %1200 = vrot.lane.b32.xlu1 %v1977_v34, %s2046_s14  ;;  %v1979_v35 = vpop.eup %1978 }
0x1199   :  { %v1110_v36 = vadd.f32 1.0, %v1979_v35 }
0x119b   :  { %1980 = vrcp.f32 %v1110_v36 }
0x119c   :  { %1982 = vpow2.f32 %v1613_v37 }
0x11a5   :  { %v1981_v38 = vpop.eup %1980 }
0x11a6   :  { %v1983_v42 = vpop.eup %1982  ;;  %v1117_v48 = vmul.f32 %v1981_v38, %v1115_v47 }
0x11a7   :  { %v1194_v43 = vadd.f32 1.0, %v1983_v42 }
0x11a9   :  { %1984 = vrcp.f32 %v1194_v43 }
0x11b3   :  { %v1985_v44 = vpop.eup %1984 }
0x11b4   :  { %v1198_v53 = vmul.f32 %v1985_v44, %v2378_v56 }
0x11f8   :  { %v1120_v39 = vpop.permute.xlu0 %1119 }
0x11f9   :  { %v1122_v41 = vmul.f32 %v1981_v38, %v1120_v39 }
0x11fb   :  { %1124 = vrot.lane.b32.xlu0 %v1122_v41, %s2047_s3 }
0x120a   :  { %v1201_v45 = vpop.permute.xlu1 %1200 }
0x120b   :  { %v1203_v46 = vmul.f32 %v1985_v44, %v1201_v45 }
0x120d   :  { %1205 = vrot.lane.b32.xlu1 %v1203_v46, %s2047_s3 }
0x126d   :  { %v1125_v49 = vpop.permute.xlu0 %1124 }
0x126e   :  { %v2418_v50 = vadd.f32 %v1125_v49, %v1117_v48 }
0x1270   :  { %1986 = vtanh.f32 %v2418_v50  ;;  %v1284_v37 = vrot.slane %v2418_v50, 7 }
0x127a   :  { %v1987_v51 = vpop.eup %1986 }
0x127b   :  { %1130 = vrot.lane.b32.xlu0 %v1987_v51, %s2046_s14 }
0x127f   :  { %v1206_v54 = vpop.permute.xlu1 %1205 }
0x1280   :  { %v2423_v55 = vadd.f32 %v1206_v54, %v1198_v53 }
0x1282   :  { %1988 = vtanh.f32 %v2423_v55 }
0x128c   :  { %v1989_v58 = vpop.eup %1988 }
0x128d   :  { %1211 = vrot.lane.b32.xlu1 %v1989_v58, %s2046_s14 }
0x12ed   :  { %v1131_v52 = vpop.permute.xlu0 %1130 }
0x12ee   :  { %v1133_v57 = vmul.f32 %v1981_v38, %v1131_v52 }
0x12f0   :  { %v1224_v60 = vpack.c.bf16 %v1133_v57, %v1133_v57  ;;  %1304 = vrot.lane.b32.xlu1 %v1133_v57, %s2047_s3 }
0x12f2   :  { %v1226_v61 = vrot.slane %v1224_v60, 3 }
0x12f4   :  { %1227 = vrot.lane.b32.xlu0 %v1226_v61, %s2047_s3  ;;  %v2018_v61 = vld [vmem:[%s2522_s5] sm:$0x1] }
0x12ff   :  { %v1212_v3 = vpop.permute.xlu1 %1211 }
0x1300   :  { %v1214_v59 = vmul.f32 %v1985_v44, %v1212_v3 }
0x1302   :  { %v2430_v56 = vrot.slane %v1214_v59, %v2213_v21 }
0x1304   :  { %1307 = vrot.lane.b32.xlu0 %v2430_v56, %s2046_s14 }
0x1362   :  { %v1305_v5 = vpop.permute.xlu1 %1304 }
0x1366   :  { %v1228_v0 = vpop.permute.xlu0 %1227 }
0x1367   :  { %1835 = vmatmul.mubr.msk.bf16.vlgmr.msra.gmra.mrb[24].mxu1 %vm68_vm1, %v1228_v0 }
0x1368   :  { %1839 = vmatpush3.bf16.msra.mxu1 %v2148_v28  ;;  %1846 = vmatprep.mubr.msk.bf16.mxu1 %vm2044_vm0, %v2043_v1 }
0x1369   :  { %1840 = vmatprep.subr.bf16.mxu1 %v2043_v1 }
0x136c   :  { %1841 = vmatpush3.bf16.msra.mxu1 %v2154_v29 }
0x136d   :  { %1842 = vmatprep.subr.bf16.mxu1 %v2043_v1 }
0x1370   :  { %1843 = vmatpush3.bf16.msra.mxu1 %v2161_v30 }
0x1371   :  { %1844 = vmatprep.subr.bf16.mxu1 %v2043_v1 }
0x1374   :  { %1845 = vmatpush3.bf16.msra.mxu1 %v2170_v32 }
0x1375   :  { %1862 = vmatprep.subr.bf16.mxu1 %v2043_v1 }
0x1376   :  { %v1308_v6 = vpop.permute.xlu0 %1307 }
0x1377   :  { %v1310_v28 = vsel %vm68_vm1, %v1305_v5, %v1308_v6 }
0x1378   :  { %v1311_v8 = vpack.c.bf16 %v1310_v28, %v1310_v28 }
0x137a   :  { %v1313_v11 = vrot.slane %v1311_v8, 3 }
0x137c   :  { %1847 = vmatmul.mubr.msk.bf16.vlgmr.msra.gmra.mrb[28].mxu1 %vm300_vm2, %v1313_v11 }
0x137d   :  { %1866 = vmatprep.mubr.msk.bf16.mxu1 %vm2044_vm0, %v2043_v1 }
0x143a   :  { %v1266_v29 = vpop.f32.mrb[24].mxu1 }
0x143b   :  { %v1273_v12 = vrot.slane %v1266_v29, 1  ;;  %v1836_v30 = vpop.f32.mrb[25].mxu1 }
0x143c   :  { %v1269_v13 = vpop.f32.mrb[26].mxu1 }
0x143d   :  { %v1275_v14 = vadd.f32 %v1273_v12, %v2137_v9  ;;  %v1837_v32 = vpop.f32.mrb[27].mxu1 }
0x143f   :  { %1990 = vtanh.f32 %v1275_v14  ;;  %v1615_v25 = vmul.f32 -1.442695, %v1275_v14 }
0x1449   :  { %v1991_v16 = vpop.eup %1990 }
0x144a   :  { %1288 = vrot.lane.b32.xlu0 %v1991_v16, %s2046_s14 }
0x144f   :  { %v1351_v10 = vpop.f32.mrb[28].mxu1 }
0x1450   :  { %v1357_v18 = vadd.f32 %v1351_v10, %v2194_v40  ;;  %v1848_v19 = vpop.f32.mrb[29].mxu1 }
0x1451   :  { %v1354_v20 = vpop.f32.mrb[30].mxu1  ;;  %v1885_v19 = vld [vmem:[%s2523_s6 + $0x8] sm:$0xff]  }
0x1452   :  { %1992 = vtanh.f32 %v1357_v18  ;;  %v1849_v22 = vpop.f32.mrb[31].mxu1  ;;  %v1617_v9 = vmul.f32 -1.442695, %v1357_v18 }
0x1453   :  { %1994 = vpow2.f32 %v1615_v25 }
0x145c   :  { %v1993_v23 = vpop.eup %1992 }
0x145d   :  { %1367 = vrot.lane.b32.xlu1 %v1993_v23, %s2046_s14  ;;  %v1995_v26 = vpop.eup %1994 }
0x145e   :  { %v1279_v27 = vadd.f32 1.0, %v1995_v26 }
0x1460   :  { %1996 = vrcp.f32 %v1279_v27  ;;  %v1551_v27 = vand.u32 127, %v370_v15 }
0x1461   :  { %1998 = vpow2.f32 %v1617_v9 }
0x1462   :  { %vm1552_vm4 = vcmp.lt.s32.totalorder %v1551_v27, 64 }
0x146a   :  { %v1997_v2 = vpop.eup %1996 }
0x146b   :  { %v1999_v34 = vpop.eup %1998  ;;  %v1286_v38 = vmul.f32 %v1997_v2, %v1284_v37 }
0x146c   :  { %v1361_v40 = vadd.f32 1.0, %v1999_v34 }
0x146e   :  { %2000 = vrcp.f32 %v1361_v40 }
0x1478   :  { %v2001_v4 = vpop.eup %2000 }
0x1479   :  { %v1365_v43 = vmul.f32 %v2001_v4, %v2423_v55 }
0x14bc   :  { %v1289_v31 = vpop.permute.xlu0 %1288 }
0x14bd   :  { %v1291_v33 = vmul.f32 %v1997_v2, %v1289_v31 }
0x14bf   :  { %1293 = vrot.lane.b32.xlu0 %v1291_v33, %s2047_s3 }
0x14cf   :  { %v1368_v35 = vpop.permute.xlu1 %1367 }
0x14d0   :  { %v1370_v36 = vmul.f32 %v2001_v4, %v1368_v35 }
0x14d2   :  { %1372 = vrot.lane.b32.xlu1 %v1370_v36, %s2047_s3 }
0x1531   :  { %v1294_v39 = vpop.permute.xlu0 %1293 }
0x1532   :  { %v1296_v41 = vadd.f32 %v1294_v39, %v1286_v38 }
0x1534   :  { %2002 = vtanh.f32 %v1296_v41 }
0x153e   :  { %v2003_v42 = vpop.eup %2002 }
0x153f   :  { %1299 = vrot.lane.b32.xlu0 %v2003_v42, %s2046_s14 }
0x1544   :  { %v1373_v44 = vpop.permute.xlu1 %1372 }
0x1545   :  { %v1375_v45 = vadd.f32 %v1373_v44, %v1365_v43 }
0x1547   :  { %2004 = vtanh.f32 %v1375_v45 }
0x1551   :  { %v2005_v46 = vpop.eup %2004 }
0x1552   :  { %1378 = vrot.lane.b32.xlu1 %v2005_v46, %s2046_s14 }
0x15b1   :  { %v1300_v47 = vpop.permute.xlu0 %1299 }
0x15b2   :  { %v1302_v48 = vmul.f32 %v1997_v2, %v1300_v47 }
0x15b4   :  { %1392 = vrot.lane.b32.xlu1 %v1302_v48, %s2047_s3 }
0x15c4   :  { %v1379_v49 = vpop.permute.xlu1 %1378 }
0x15c5   :  { %v1381_v50 = vmul.f32 %v2001_v4, %v1379_v49 }
0x15c7   :  { %v1386_v51 = vrot.slane %v1381_v50, %v2213_v21 }
0x15c9   :  { %1395 = vrot.lane.b32.xlu0 %v1386_v51, %s2046_s14 }
0x1626   :  { %v1393_v53 = vpop.permute.xlu1 %1392 }
0x163b   :  { %v1396_v54 = vpop.permute.xlu0 %1395 }
0x163c   :  { %v1398_v55 = vsel %vm68_vm1, %v1393_v53, %v1396_v54 }
0x163d   :  { %v1399_v58 = vpack.c.bf16 %v1398_v55, %v1398_v55 }
0x163f   :  { %v1401_v52 = vshrl.u32 %v1399_v58, 16 }
0x1641   :  { %v1403_v57 = vrot.slane %v1401_v52, 3 }
0x1643   :  { %1859 = vmatmul.mubr.msk.bf16.vlgmr.msra.gmra.mrb[32].mxu0 %vm300_vm2, %v1403_v57 }
0x1716   :  { %v1441_v60 = vpop.f32.mrb[32].mxu0 }
0x1717   :  { %v1447_v3 = vadd.f32 %v2018_v61, %v1441_v60  ;;  %v1860_v59 = vpop.f32.mrb[33].mxu0 }
0x1718   :  { %v1444_v0 = vpop.f32.mrb[34].mxu0 }
0x1719   :  { %2006 = vtanh.f32 %v1447_v3  ;;  %v1861_v5 = vpop.f32.mrb[35].mxu0  ;;  %v1619_v28 = vmul.f32 -1.442695, %v1447_v3 }
0x171b   :  { %2008 = vpow2.f32 %v1619_v28 }
0x1723   :  { %v2007_v6 = vpop.eup %2006 }
0x1724   :  { %1457 = vrot.lane.b32.xlu1 %v2007_v6, %s2046_s14 }
0x1725   :  { %v2009_v8 = vpop.eup %2008 }
0x1726   :  { %v1451_v11 = vadd.f32 1.0, %v2009_v8 }
0x1728   :  { %2010 = vrcp.f32 %v1451_v11 }
0x1732   :  { %v2011_v29 = vpop.eup %2010 }
0x1733   :  { %v1455_v13 = vmul.f32 %v2011_v29, %v1375_v45 }
0x1796   :  { %v1458_v12 = vpop.permute.xlu1 %1457 }
0x1797   :  { %v1460_v30 = vmul.f32 %v2011_v29, %v1458_v12 }
0x1799   :  { %1462 = vrot.lane.b32.xlu0 %v1460_v30, %s2047_s3 }
0x179d   :  { %374 = vrot.lane.b32.xlu0 %v2217_v24, %s2047_s3 }
0x17a1   :  { %711 = vrot.lane.b32.xlu0 %v2301_v7, %s2047_s3 }
0x17a5   :  { %1049 = vrot.lane.b32.xlu0 %v2385_v62, %s2047_s3  ;;  %v1884_v62 = vld [vmem:[%s2523_s6] sm:$0xff]  }
0x17a6   :  { %1863 = vmatpush3.bf16.msra.mxu1 %v1884_v62 }
0x17a7   :  { %1864 = vmatprep.subr.bf16.mxu1 %v2043_v1 }
0x17a9   :  { %1387 = vrot.lane.b32.xlu0 %v1386_v51, %s2047_s3 }
0x17aa   :  { %1865 = vmatpush3.bf16.msra.mxu1 %v1885_v19 }
0x180b   :  { %v1463_v14 = vpop.permute.xlu0 %1462 }
0x180c   :  { %v1465_v32 = vadd.f32 %v1463_v14, %v1455_v13 }
0x180e   :  { %2012 = vtanh.f32 %v1465_v32 }
0x180f   :  { %v375_v16 = vpop.permute.xlu0 %374 }
0x1810   :  { %378 = vst.msk [vmem:[#allocation2] sm:$0x1] %vm377_vm3, %v375_v16 }
0x1813   :  { %v712_v10 = vpop.permute.xlu0 %711 }
0x1814   :  { %714 = vst.msk [vmem:[#allocation2 + $0x2] sm:$0x1] %vm377_vm3, %v712_v10 }
0x1817   :  { %v1050_v24 = vpop.permute.xlu0 %1049 }
0x1818   :  { %v2013_v18 = vpop.eup %2012  ;;  %1052 = vst.msk [vmem:[#allocation2 + $0x4] sm:$0x1] %vm377_vm3, %v1050_v24 }
0x1819   :  { %1468 = vrot.lane.b32.xlu1 %v2013_v18, %s2046_s14 }
0x181b   :  { %v1388_v7 = vpop.permute.xlu0 %1387 }
0x181c   :  { %1390 = vst.msk [vmem:[#allocation2 + $0x6] sm:$0x1] %vm377_vm3, %v1388_v7 }
0x181d   :  { %544 = vrot.lane.b32.xlu1 %v2259_v17, %s2047_s3 }
0x1821   :  { %882 = vrot.lane.b32.xlu1 %v2343_v63, %s2047_s3 }
0x1825   :  { %1220 = vrot.lane.b32.xlu1 %v2430_v56, %s2047_s3 }
0x188b   :  { %v1469_v20 = vpop.permute.xlu1 %1468 }
0x188c   :  { %v1471_v17 = vmul.f32 %v2011_v29, %v1469_v20 }
0x188e   :  { %v1476_v22 = vrot.slane %v1471_v17, %v2213_v21  ;;  %v1620_v21 = vld [vmem:[%s2524_s7] ss:$0 sm:$0xff]  ;;  %s2048_s7 = smov [#allocation3]  }
0x188f   :  { %v545_v63 = vpop.permute.xlu1 %544  ;;  %s1571_s30 = sshll.u32 %s2048_s7, 4  ;;  %s1572_s30 = int_to_ptr.vmem [resolvable:$true] %s1571_s30 }
0x1890   :  { %547 = vst.msk [vmem:[#allocation2 + $0x1] sm:$0x1] %vm377_vm3, %v545_v63  ;;  %1477 = vrot.lane.b32.xlu1 %v1476_v22, %s2047_s3  ;;  %s2019_s9 = scalar_lea.vmem %s1572_s30, 128  ;;  %p2024_p1 = scmp.lt.s32.totalorder %s1572_s30, %s1572_s30 }
0x1891   :  { %p2020_p0 = scmp.ne.s32.totalorder %s1572_s30, %s2019_s9  ;;  %p2025_p2 = scmp.lt.s32.totalorder %s2019_s9, %s2019_s9 }
0x1893   :  { %v883_v56 = vpop.permute.xlu1 %882  ;;  %p2026_p3 = por %p2025_p2, %p2024_p1 }
0x1894   :  { %885 = vst.msk [vmem:[#allocation2 + $0x3] sm:$0x1] %vm377_vm3, %v883_v56 }
0x1895   :  { %p2027_p4 = pnand %p2026_p3, %p2020_p0 }
0x1897   :  { %v1221_v23 = vpop.permute.xlu1 %1220 }
0x1898   :  { %1223 = vst.msk [vmem:[#allocation2 + $0x5] sm:$0x1] %vm377_vm3, %v1221_v23 }
0x1902   :  { %v1478_v25 = vpop.permute.xlu1 %1477 }
0x1903   :  { %1480 = vst.msk [vmem:[#allocation2 + $0x7] sm:$0x1] %vm377_vm3, %v1478_v25 }
0x190a   :  { %v1481_v1 = vld [vmem:[#allocation2] sm:$0xff] }
0x190b   :  { %v1482_v26 = vpack.c.bf16 %v1481_v1, %v1481_v1 }
0x190d   :  { %1867 = vmatmul.mubr.msk.bf16.vlgmr.msra.gmra.mrb[32].mxu1 %vm68_vm1, %v1482_v26 }
0x19e0   :  { %v1543_v9 = vpop.f32.mrb[32].mxu1 }
0x19e1   :  { %v1544_v2 = vadd.f32 %v1620_v21, %v1543_v9  ;;  %v1868_v31 = vpop.f32.mrb[33].mxu1 }
0x19e2   :  { %v1546_v33 = vpop.f32.mrb[34].mxu1 }
0x19e3   :  { %v1549_v34 = vmax.f32 %v1544_v2, 0.0  ;;  %v1869_v40 = vpop.f32.mrb[35].mxu1 }
0x19e5   :  { %v1553_v4 = vsel %vm1552_vm4, %v1549_v34, -1e+30 }
0x19e6   :  { %1554 = vmax.xlane.f32.xlu0 %v1553_v4 }
0x1a73   :  { %v1555_v35 = vpop.xlane.xlu0 %1554 }
0x1a74   :  { %v1556_v36 = vsub.f32 %v1553_v4, %v1555_v35 }
0x1a76   :  { %v1557_v37 = vmul.f32 1.442695, %v1556_v36 }
0x1a78   :  { %2014 = vpow2.f32 %v1557_v37 }
0x1a82   :  { %v2015_v38 = vpop.eup %2014 }
0x1a83   :  { %1559 = vadd.xlane.f32.xlu1 %v2015_v38 }
0x1b10   :  { %v1560_v39 = vpop.xlane.xlu1 %1559 }
0x1b11   :  { %2016 = vlog2.f32 %v1560_v39 }
0x1b1b   :  { %v2017_v41 = vpop.eup %2016 }
0x1b1c   :  { %v1562_v15 = vmul.f32 0.6931472, %v2017_v41 }
0x1b1e   :  { %v1563_v42 = vsub.f32 %v1556_v36, %v1562_v15 }
0x1b20   :  { %1564 = vst [vmem:[#allocation3] sm:$0xff] %v1563_v42 }
0x1b21   :  { %2030 = shalt.err (!%p2027_p4)
}
0x1b22   :  { %s2031_s12 = scalar_lea.hbm %s2525_s8, 128 }
0x1b23   :  { %p2032_p5 = scmp.ne.s32.totalorder %s2525_s8, %s2031_s12  ;;  %p2035_p6 = scmp.lt.u32.totalorder %s2031_s12, %s2525_s8 }
0x1b25   :  { %p2037_p7 = pnand %p2035_p6, %p2032_p5 }
0x1b27   :  { %2040 = shalt.err (!%p2037_p7)
}
0x1b28   :  { %1574 = dma.vmem_to_hbm [thread:$0]  %s1572_s30, 128, %s2525_s8, [#allocation4]  }
0x1b29   :  { %2041 = dma.done.wait [#allocation4], 128  }
0x1b2a   :  { %2042 = vsyncadd [#allocation4], 4294967168 }
0x1b2b   :  { %1578 = vsyncpa [#allocation4], 1 }

</bundles_post_ra>
